<compile_context>
chip_gen: v5e
topology: v5e:2x2
jax: 0.10.0
libtpu: 0.0.40
codegen_flags: <defaults>
</compile_context>

<pallas_src>
import math
import functools

import jax
import jax.numpy as jnp
from jax.experimental import pallas as pl
from jax.experimental.pallas import tpu as pltpu


def _layer_norm(x, gamma, beta, eps=1e-5):
    mean = jnp.mean(x, axis=-1, keepdims=True)
    var = jnp.mean((x - mean) ** 2, axis=-1, keepdims=True)
    return (x - mean) * jax.lax.rsqrt(var + eps) * gamma + beta


def encoder_kernel(hs_ref, mask_ref,
                   wqkv_ref, bqkv_ref,
                   ln1_g_ref, ln1_b_ref,
                   w1_ref, b1_ref, w2_ref, b2_ref,
                   ln2_g_ref, ln2_b_ref,
                   out_ref,
                   *, num_heads, seq_len, batch_tile):
    TB, S = batch_tile, seq_len
    hs = hs_ref[...]                                  # (TB*S, D) f32
    D = hs.shape[-1]
    dh = D // num_heads

    # ---- fused QKV projection: one MXU pass (bf16 operands, f32 accumulation).
    # 1/sqrt(dh) is already folded into the Q columns of wqkv/bqkv.
    qkv = jnp.dot(hs.astype(jnp.bfloat16), wqkv_ref[...],
                  preferred_element_type=jnp.float32) + bqkv_ref[...]   # (TB*S, 3D)

    # (TB*S, D) -> (TB, S, D) for batched-over-batch attention (S is a sublane multiple)
    q3 = qkv[:, :D].reshape(TB, S, D).astype(jnp.bfloat16)
    k3 = qkv[:, D:2 * D].reshape(TB, S, D).astype(jnp.bfloat16)
    v3 = qkv[:, 2 * D:].reshape(TB, S, D).astype(jnp.bfloat16)

    # Hoist the additive-mask broadcast out of the (unrolled) head loop.
    mask_b = jnp.broadcast_to(mask_ref[...], (TB, S, S))                # (TB, S, S) f32

    # ---- attention: per-head, batched over TB; head outputs stay in vregs and are
    # assembled once (no narrow masked stores, no scratch reload).
    head_outs = []
    for h in range(num_heads):
        sl = slice(h * dh, (h + 1) * dh)
        s = jnp.einsum('bqd,bkd->bqk', q3[:, :, sl], k3[:, :, sl],
                       preferred_element_type=jnp.float32)             # (TB, S, S)
        s = s + mask_b
        s = s - jnp.max(s, axis=-1, keepdims=True)
        p = jnp.exp(s)
        p = p * pl.reciprocal(jnp.sum(p, axis=-1, keepdims=True), approx=True)
        head_outs.append(jnp.einsum('bqk,bkd->bqd', p.astype(jnp.bfloat16), v3[:, :, sl],
                                    preferred_element_type=jnp.float32))  # (TB, S, dh)
    attn3 = head_outs[0] if num_heads == 1 else jnp.concatenate(head_outs, axis=-1)
    attn = attn3.reshape(TB * S, D)                                     # (TB*S, D) f32

    # dropout1 -> identity; residual + LayerNorm 1 (f32)
    x1 = _layer_norm(attn + hs, ln1_g_ref[...], ln1_b_ref[...])

    # MLP: Linear -> ReLU -> (Dropout=identity) -> Linear (bf16 matmuls, f32 accumulate)
    h1 = jnp.dot(x1.astype(jnp.bfloat16), w1_ref[...],
                 preferred_element_type=jnp.float32) + b1_ref[...]
    h1 = jnp.maximum(h1, 0.0)
    mlp = jnp.dot(h1.astype(jnp.bfloat16), w2_ref[...],
                  preferred_element_type=jnp.float32) + b2_ref[...]

    # dropout2 -> identity; residual + LayerNorm 2
    out_ref[...] = _layer_norm(mlp + x1, ln2_g_ref[...], ln2_b_ref[...]).astype(out_ref.dtype)


def _pick_batch_tile(B, S, target_rows=1024, min_steps=2):
    """Pick TB (divisor of B) so TB*S lands near 512-1024 rows, preferring 256-row
    multiples (v6e/v7x MXU) and keeping >=2 grid steps (v7x megacore)."""
    cands = []
    for tb in range(1, B + 1):
        if B % tb:
            continue
        if B >= min_steps and B // tb < min_steps:
            continue                      # never TB=B: keep the parallel axis splittable
        if tb * S <= target_rows:
            cands.append(tb)
    if not cands:
        return 1
    # First preference: largest 256-multiple row count in [512, target_rows].
    pref = [tb for tb in cands if tb * S >= 512 and (tb * S) % 256 == 0]
    pool = pref if pref else cands
    return max(pool, key=lambda tb: tb * S)


def _vmem_budget_bytes(TB, S, D, F):
    rows = TB * S
    weights = (D * 3 * D + 2 * D * F) * 2 + (3 * D + F + 6 * D) * 4        # bf16 weights + f32 biases/LN
    act_io = 2 * (rows * D * 4 + TB * S * 4 + rows * D * 4)                 # double-buffered hs / mask / out
    interm = rows * (3 * D * 4 + 3 * D * 2 + 6 * D * 4 + 2 * F * 4) + 2 * TB * S * S * 4
    budget = 2 * (weights + act_io + interm)                                 # 2x headroom
    return int(min(max(budget, 32 << 20), 64 << 20))                        # clamp: >=32 MiB, <=v7x physical


def prepare_encoder_params(params, *, num_heads):
    """One-time weight prep: fuse QKV, fold 1/sqrt(dh) into Q, cast matmul weights to bf16."""
    D = params["wq"].shape[0]
    dh = D // num_heads
    scale = 1.0 / math.sqrt(dh)
    return {
        "wqkv": jnp.concatenate([params["wq"] * scale, params["wk"], params["wv"]],
                                axis=1).astype(jnp.bfloat16),                # (D, 3D)
        "bqkv": jnp.concatenate([params["bq"] * scale, params["bk"], params["bv"]],
                                axis=1).astype(jnp.float32),                 # (1, 3D)
        "ln1_g": params["ln1_g"].astype(jnp.float32), "ln1_b": params["ln1_b"].astype(jnp.float32),
        "w1": params["w1"].astype(jnp.bfloat16), "b1": params["b1"].astype(jnp.float32),
        "w2": params["w2"].astype(jnp.bfloat16), "b2": params["b2"].astype(jnp.float32),
        "ln2_g": params["ln2_g"].astype(jnp.float32), "ln2_b": params["ln2_b"].astype(jnp.float32),
    }


def _run_encoder_call(hs2d, mask3, prep, *, B, S, D, F, TB, num_heads,
                      single_buffer_weights):
    """Build the pallas_call (optionally single-buffering constant-index weights) and run it."""
    wkw = {"pipeline_mode": pl.Buffered(1)} if single_buffer_weights else {}
    full = lambda shape: pl.BlockSpec(shape, lambda b: (0,) * len(shape), **wkw)
    in_specs = [
        pl.BlockSpec((TB * S, D), lambda b: (b, 0)),    # hidden_states (flattened)
        pl.BlockSpec((TB, 1, S), lambda b: (b, 0, 0)),  # additive mask
        full((D, 3 * D)), full((1, 3 * D)),             # fused qkv weight / bias (q pre-scaled)
        full((1, D)), full((1, D)),                     # ln1 gamma, beta
        full((D, F)), full((1, F)),                     # w1, b1
        full((F, D)), full((1, D)),                     # w2, b2
        full((1, D)), full((1, D)),                     # ln2 gamma, beta
    ]
    kernel = functools.partial(encoder_kernel, num_heads=num_heads, seq_len=S, batch_tile=TB)
    out2d = pl.pallas_call(
        kernel,
        out_shape=jax.ShapeDtypeStruct((B * S, D), jnp.float32),
        grid_spec=pltpu.PrefetchScalarGridSpec(
            num_scalar_prefetch=0,
            grid=(B // TB,),
            in_specs=in_specs,
            out_specs=pl.BlockSpec((TB * S, D), lambda b: (b, 0)),
        ),
        compiler_params=pltpu.CompilerParams(
            dimension_semantics=("parallel",),
            vmem_limit_bytes=_vmem_budget_bytes(TB, S, D, F)),
    )(hs2d, mask3,
      prep["wqkv"], prep["bqkv"],
      prep["ln1_g"], prep["ln1_b"],
      prep["w1"], prep["b1"], prep["w2"], prep["b2"],
      prep["ln2_g"], prep["ln2_b"])
    return jax.block_until_ready(out2d)


def encoder_forward(hidden_states, prot_mask, prep, *, num_heads, batch_tile=None):
    """hidden_states: (B, S, D) f32. prot_mask: (B, 1, 1, S) additive mask.
    prep: output of prepare_encoder_params (weights pre-fused / pre-cast once)."""
    B, S, D = hidden_states.shape
    F = prep["w1"].shape[1]
    TB = batch_tile or _pick_batch_tile(B, S)
    assert B % TB == 0

    # Flatten batch*seq so the big matmuls see a tall (TB*S, D) LHS per grid step.
    hs2d = hidden_states.reshape(B * S, D).astype(jnp.float32)
    mask3 = prot_mask.reshape(B, 1, S).astype(jnp.float32)

    kwargs = dict(B=B, S=S, D=D, F=F, TB=TB, num_heads=num_heads)
    try:
        out2d = _run_encoder_call(hs2d, mask3, prep, single_buffer_weights=True, **kwargs)
    except Exception:
        # Fallback for JAX/Mosaic versions that reject Buffered(1) on constant-index specs.
        out2d = _run_encoder_call(hs2d, mask3, prep, single_buffer_weights=False, **kwargs)
    return out2d.reshape(B, S, D)


def _reference_forward(hs, mask, params, num_heads):
    """Pure-JAX f32 reference matching the PyTorch forward (eval mode)."""
    B, S, D = hs.shape
    dh = D // num_heads
    lin = lambda x, w, b: x @ w + b

    def split(x):  # (B,S,D) -> (B,H,S,dh)
        return x.reshape(B, S, num_heads, dh).transpose(0, 2, 1, 3)

    q = split(lin(hs, params["wq"], params["bq"]))
    k = split(lin(hs, params["wk"], params["bk"]))
    v = split(lin(hs, params["wv"], params["bv"]))
    score = jnp.einsum("bhqd,bhkd->bhqk", q, k) / math.sqrt(dh) + mask
    attn = jax.nn.softmax(score, axis=-1)
    c = jnp.einsum("bhqk,bhkd->bhqd", attn, v).transpose(0, 2, 1, 3).reshape(B, S, D)
    x1 = _layer_norm(c + hs, params["ln1_g"], params["ln1_b"])
    m = jnp.maximum(lin(x1, params["w1"], params["b1"]), 0.0)
    m = lin(m, params["w2"], params["b2"])
    return _layer_norm(m + x1, params["ln2_g"], params["ln2_b"])


if __name__ == "__main__":
    B, S, D, H, F = 2, 8, 32, 4, 64  # batch, seq, embed_dim, num_heads, ffn_hidden

    key = jax.random.PRNGKey(0)
    keys = jax.random.split(key, 12)
    scale = 0.1
    params = {
        "wq": scale * jax.random.normal(keys[0], (D, D), jnp.float32),
        "bq": scale * jax.random.normal(keys[1], (1, D), jnp.float32),
        "wk": scale * jax.random.normal(keys[2], (D, D), jnp.float32),
        "bk": scale * jax.random.normal(keys[3], (1, D), jnp.float32),
        "wv": scale * jax.random.normal(keys[4], (D, D), jnp.float32),
        "bv": scale * jax.random.normal(keys[5], (1, D), jnp.float32),
        "ln1_g": jnp.ones((1, D), jnp.float32),
        "ln1_b": jnp.zeros((1, D), jnp.float32),
        "w1": scale * jax.random.normal(keys[6], (D, F), jnp.float32),
        "b1": scale * jax.random.normal(keys[7], (1, F), jnp.float32),
        "w2": scale * jax.random.normal(keys[8], (F, D), jnp.float32),
        "b2": scale * jax.random.normal(keys[9], (1, D), jnp.float32),
        "ln2_g": jnp.ones((1, D), jnp.float32),
        "ln2_b": jnp.zeros((1, D), jnp.float32),
    }

    hidden_states = jax.random.normal(keys[10], (B, S, D), jnp.float32)
    # Additive attention mask (B, 1, 1, S): 0 for valid positions, -1e9 for padding.
    lengths = jnp.array([S, 5])
    valid = (jnp.arange(S)[None, :] < lengths[:, None]).astype(jnp.float32)
    prot_mask = ((1.0 - valid) * -1e9).reshape(B, 1, 1, S)

    # One-time weight prep (fused QKV, folded q-scale, bf16 casts) outside the forward call.
    prep = jax.block_until_ready(prepare_encoder_params(params, num_heads=H))

    out = encoder_forward(hidden_states, prot_mask, prep, num_heads=H)
    out = jax.block_until_ready(out)

    ref = _reference_forward(hidden_states, prot_mask, params, H)
    assert out.shape == (B, S, D)
    # bf16 matmul operands + approx reciprocal -> relaxed tolerance vs f32 reference.
    assert jnp.allclose(out, ref, atol=3e-2, rtol=3e-2), "mismatch vs pure-JAX reference"

    print("KERNEL_OK")
</pallas_src>

<mosaic_0001>
module attributes {stable_mosaic.version = 11 : i64} {
  func.func @encoder_kernel(%arg0: i32, %arg1: memref<8x32xf32, #tpu.memory_space<vmem>>, %arg2: memref<1x1x8xf32, #tpu.memory_space<vmem>>, %arg3: memref<32x96xbf16, #tpu.memory_space<vmem>>, %arg4: memref<1x96xf32, #tpu.memory_space<vmem>>, %arg5: memref<1x32xf32, #tpu.memory_space<vmem>>, %arg6: memref<1x32xf32, #tpu.memory_space<vmem>>, %arg7: memref<32x64xbf16, #tpu.memory_space<vmem>>, %arg8: memref<1x64xf32, #tpu.memory_space<vmem>>, %arg9: memref<64x32xbf16, #tpu.memory_space<vmem>>, %arg10: memref<1x32xf32, #tpu.memory_space<vmem>>, %arg11: memref<1x32xf32, #tpu.memory_space<vmem>>, %arg12: memref<1x32xf32, #tpu.memory_space<vmem>>, %arg13: memref<8x32xf32, #tpu.memory_space<vmem>>) attributes {dimension_semantics = [#tpu.dimension_semantics<parallel>], iteration_bounds = array<i64: 2>, scalar_prefetch = 0 : i64, scratch_operands = 0 : i64, tpu.core_type = #tpu.core_type<tc>, window_params = [{transform_indices = @transform_0, window_bounds = array<i64: 8, 32>}, {transform_indices = @transform_1, window_bounds = array<i64: 1, 1, 8>}, {pipeline_mode = #tpu.pipeline_mode<synchronous>, transform_indices = @transform_2, window_bounds = array<i64: 32, 96>}, {pipeline_mode = #tpu.pipeline_mode<synchronous>, transform_indices = @transform_3, window_bounds = array<i64: 1, 96>}, {pipeline_mode = #tpu.pipeline_mode<synchronous>, transform_indices = @transform_4, window_bounds = array<i64: 1, 32>}, {pipeline_mode = #tpu.pipeline_mode<synchronous>, transform_indices = @transform_5, window_bounds = array<i64: 1, 32>}, {pipeline_mode = #tpu.pipeline_mode<synchronous>, transform_indices = @transform_6, window_bounds = array<i64: 32, 64>}, {pipeline_mode = #tpu.pipeline_mode<synchronous>, transform_indices = @transform_7, window_bounds = array<i64: 1, 64>}, {pipeline_mode = #tpu.pipeline_mode<synchronous>, transform_indices = @transform_8, window_bounds = array<i64: 64, 32>}, {pipeline_mode = #tpu.pipeline_mode<synchronous>, transform_indices = @transform_9, window_bounds = array<i64: 1, 32>}, {pipeline_mode = #tpu.pipeline_mode<synchronous>, transform_indices = @transform_10, window_bounds = array<i64: 1, 32>}, {pipeline_mode = #tpu.pipeline_mode<synchronous>, transform_indices = @transform_11, window_bounds = array<i64: 1, 32>}, {transform_indices = @transform_12, window_bounds = array<i64: 8, 32>}]} {
    %c0 = arith.constant 0 : index
    %c0_0 = arith.constant 0 : index
    %0 = vector.load %arg1[%c0, %c0_0] : memref<8x32xf32, #tpu.memory_space<vmem>>, vector<8x32xf32>
    %1 = arith.truncf %0 : vector<8x32xf32> to vector<8x32xbf16>
    %c0_1 = arith.constant 0 : index
    %c0_2 = arith.constant 0 : index
    %2 = vector.load %arg3[%c0_1, %c0_2] : memref<32x96xbf16, #tpu.memory_space<vmem>>, vector<32x96xbf16>
    %cst = arith.constant dense<0.000000e+00> : vector<8x96xf32>
    %3 = tpu.matmul %1, %2, %cst {dimension_numbers = #tpu.dot_dimension_numbers<[1], [0], [0], [1], [0, 0, 1, 1], [], []>} : vector<8x32xbf16>, vector<32x96xbf16>, vector<8x96xf32> -> vector<8x96xf32>
    %c0_3 = arith.constant 0 : index
    %c0_4 = arith.constant 0 : index
    %4 = vector.load %arg4[%c0_3, %c0_4] : memref<1x96xf32, #tpu.memory_space<vmem>>, vector<1x96xf32>
    %5 = vector.broadcast %4 : vector<1x96xf32> to vector<8x96xf32>
    %6 = arith.addf %3, %5 : vector<8x96xf32>
    %7 = vector.extract_strided_slice %6 {offsets = [0, 0], sizes = [8, 32], strides = [1, 1]} : vector<8x96xf32> to vector<8x32xf32>
    %8 = vector.shape_cast %7 : vector<8x32xf32> to vector<1x8x32xf32>
    %9 = arith.truncf %8 : vector<1x8x32xf32> to vector<1x8x32xbf16>
    %10 = vector.extract_strided_slice %6 {offsets = [0, 32], sizes = [8, 32], strides = [1, 1]} : vector<8x96xf32> to vector<8x32xf32>
    %11 = vector.shape_cast %10 : vector<8x32xf32> to vector<1x8x32xf32>
    %12 = arith.truncf %11 : vector<1x8x32xf32> to vector<1x8x32xbf16>
    %13 = vector.extract_strided_slice %6 {offsets = [0, 64], sizes = [8, 32], strides = [1, 1]} : vector<8x96xf32> to vector<8x32xf32>
    %14 = vector.shape_cast %13 : vector<8x32xf32> to vector<1x8x32xf32>
    %15 = arith.truncf %14 : vector<1x8x32xf32> to vector<1x8x32xbf16>
    %c0_5 = arith.constant 0 : index
    %c0_6 = arith.constant 0 : index
    %c0_7 = arith.constant 0 : index
    %16 = vector.load %arg2[%c0_5, %c0_6, %c0_7] : memref<1x1x8xf32, #tpu.memory_space<vmem>>, vector<1x1x8xf32>
    %17 = vector.shape_cast %16 : vector<1x1x8xf32> to vector<1x1x8xf32>
    %18 = vector.broadcast %17 : vector<1x1x8xf32> to vector<1x8x8xf32>
    %19 = vector.extract_strided_slice %9 {offsets = [0, 0, 0], sizes = [1, 8, 8], strides = [1, 1, 1]} : vector<1x8x32xbf16> to vector<1x8x8xbf16>
    %20 = vector.extract_strided_slice %12 {offsets = [0, 0, 0], sizes = [1, 8, 8], strides = [1, 1, 1]} : vector<1x8x32xbf16> to vector<1x8x8xbf16>
    "tpu.trace_start"() <{level = 10 : i32, message = "bqd,bkd->bqk"}> : () -> ()
    %cst_8 = arith.constant dense<0.000000e+00> : vector<1x8x8xf32>
    %21 = tpu.matmul %19, %20, %cst_8 {dimension_numbers = #tpu.dot_dimension_numbers<[2], [2], [1], [1], [0, 0, 0, 1, 1, 1], [0], [0]>} : vector<1x8x8xbf16>, vector<1x8x8xbf16>, vector<1x8x8xf32> -> vector<1x8x8xf32>
    "tpu.trace_stop"() : () -> ()
    %22 = arith.addf %21, %18 : vector<1x8x8xf32>
    %cst_9 = arith.constant dense<0xFF800000> : vector<1x8xf32>
    %23 = vector.multi_reduction <maximumf>, %22, %cst_9 [2] : vector<1x8x8xf32> to vector<1x8xf32>
    %24 = vector.shape_cast %23 : vector<1x8xf32> to vector<1x8x1xf32>
    %25 = vector.broadcast %24 : vector<1x8x1xf32> to vector<1x8x8xf32>
    %26 = arith.subf %22, %25 : vector<1x8x8xf32>
    %27 = math.exp %26 : vector<1x8x8xf32>
    %cst_10 = arith.constant dense<0.000000e+00> : vector<1x8xf32>
    %28 = vector.multi_reduction <add>, %27, %cst_10 [2] : vector<1x8x8xf32> to vector<1x8xf32>
    %29 = vector.shape_cast %28 : vector<1x8xf32> to vector<1x8x1xf32>
    %30 = tpu.reciprocal %29 {approx = true} : vector<1x8x1xf32> -> vector<1x8x1xf32>
    %31 = vector.broadcast %30 : vector<1x8x1xf32> to vector<1x8x8xf32>
    %32 = arith.mulf %27, %31 : vector<1x8x8xf32>
    %33 = arith.truncf %32 : vector<1x8x8xf32> to vector<1x8x8xbf16>
    %34 = vector.extract_strided_slice %15 {offsets = [0, 0, 0], sizes = [1, 8, 8], strides = [1, 1, 1]} : vector<1x8x32xbf16> to vector<1x8x8xbf16>
    "tpu.trace_start"() <{level = 10 : i32, message = "bqk,bkd->bqd"}> : () -> ()
    %cst_11 = arith.constant dense<0.000000e+00> : vector<1x8x8xf32>
    %35 = tpu.matmul %33, %34, %cst_11 {dimension_numbers = #tpu.dot_dimension_numbers<[2], [1], [1], [2], [0, 0, 0, 1, 1, 2], [0], [0]>} : vector<1x8x8xbf16>, vector<1x8x8xbf16>, vector<1x8x8xf32> -> vector<1x8x8xf32>
    "tpu.trace_stop"() : () -> ()
    %36 = vector.extract_strided_slice %9 {offsets = [0, 0, 8], sizes = [1, 8, 8], strides = [1, 1, 1]} : vector<1x8x32xbf16> to vector<1x8x8xbf16>
    %37 = vector.extract_strided_slice %12 {offsets = [0, 0, 8], sizes = [1, 8, 8], strides = [1, 1, 1]} : vector<1x8x32xbf16> to vector<1x8x8xbf16>
    "tpu.trace_start"() <{level = 10 : i32, message = "bqd,bkd->bqk"}> : () -> ()
    %cst_12 = arith.constant dense<0.000000e+00> : vector<1x8x8xf32>
    %38 = tpu.matmul %36, %37, %cst_12 {dimension_numbers = #tpu.dot_dimension_numbers<[2], [2], [1], [1], [0, 0, 0, 1, 1, 1], [0], [0]>} : vector<1x8x8xbf16>, vector<1x8x8xbf16>, vector<1x8x8xf32> -> vector<1x8x8xf32>
    "tpu.trace_stop"() : () -> ()
    %39 = arith.addf %38, %18 : vector<1x8x8xf32>
    %cst_13 = arith.constant dense<0xFF800000> : vector<1x8xf32>
    %40 = vector.multi_reduction <maximumf>, %39, %cst_13 [2] : vector<1x8x8xf32> to vector<1x8xf32>
    %41 = vector.shape_cast %40 : vector<1x8xf32> to vector<1x8x1xf32>
    %42 = vector.broadcast %41 : vector<1x8x1xf32> to vector<1x8x8xf32>
    %43 = arith.subf %39, %42 : vector<1x8x8xf32>
    %44 = math.exp %43 : vector<1x8x8xf32>
    %cst_14 = arith.constant dense<0.000000e+00> : vector<1x8xf32>
    %45 = vector.multi_reduction <add>, %44, %cst_14 [2] : vector<1x8x8xf32> to vector<1x8xf32>
    %46 = vector.shape_cast %45 : vector<1x8xf32> to vector<1x8x1xf32>
    %47 = tpu.reciprocal %46 {approx = true} : vector<1x8x1xf32> -> vector<1x8x1xf32>
    %48 = vector.broadcast %47 : vector<1x8x1xf32> to vector<1x8x8xf32>
    %49 = arith.mulf %44, %48 : vector<1x8x8xf32>
    %50 = arith.truncf %49 : vector<1x8x8xf32> to vector<1x8x8xbf16>
    %51 = vector.extract_strided_slice %15 {offsets = [0, 0, 8], sizes = [1, 8, 8], strides = [1, 1, 1]} : vector<1x8x32xbf16> to vector<1x8x8xbf16>
    "tpu.trace_start"() <{level = 10 : i32, message = "bqk,bkd->bqd"}> : () -> ()
    %cst_15 = arith.constant dense<0.000000e+00> : vector<1x8x8xf32>
    %52 = tpu.matmul %50, %51, %cst_15 {dimension_numbers = #tpu.dot_dimension_numbers<[2], [1], [1], [2], [0, 0, 0, 1, 1, 2], [0], [0]>} : vector<1x8x8xbf16>, vector<1x8x8xbf16>, vector<1x8x8xf32> -> vector<1x8x8xf32>
    "tpu.trace_stop"() : () -> ()
    %53 = vector.extract_strided_slice %9 {offsets = [0, 0, 16], sizes = [1, 8, 8], strides = [1, 1, 1]} : vector<1x8x32xbf16> to vector<1x8x8xbf16>
    %54 = vector.extract_strided_slice %12 {offsets = [0, 0, 16], sizes = [1, 8, 8], strides = [1, 1, 1]} : vector<1x8x32xbf16> to vector<1x8x8xbf16>
    "tpu.trace_start"() <{level = 10 : i32, message = "bqd,bkd->bqk"}> : () -> ()
    %cst_16 = arith.constant dense<0.000000e+00> : vector<1x8x8xf32>
    %55 = tpu.matmul %53, %54, %cst_16 {dimension_numbers = #tpu.dot_dimension_numbers<[2], [2], [1], [1], [0, 0, 0, 1, 1, 1], [0], [0]>} : vector<1x8x8xbf16>, vector<1x8x8xbf16>, vector<1x8x8xf32> -> vector<1x8x8xf32>
    "tpu.trace_stop"() : () -> ()
    %56 = arith.addf %55, %18 : vector<1x8x8xf32>
    %cst_17 = arith.constant dense<0xFF800000> : vector<1x8xf32>
    %57 = vector.multi_reduction <maximumf>, %56, %cst_17 [2] : vector<1x8x8xf32> to vector<1x8xf32>
    %58 = vector.shape_cast %57 : vector<1x8xf32> to vector<1x8x1xf32>
    %59 = vector.broadcast %58 : vector<1x8x1xf32> to vector<1x8x8xf32>
    %60 = arith.subf %56, %59 : vector<1x8x8xf32>
    %61 = math.exp %60 : vector<1x8x8xf32>
    %cst_18 = arith.constant dense<0.000000e+00> : vector<1x8xf32>
    %62 = vector.multi_reduction <add>, %61, %cst_18 [2] : vector<1x8x8xf32> to vector<1x8xf32>
    %63 = vector.shape_cast %62 : vector<1x8xf32> to vector<1x8x1xf32>
    %64 = tpu.reciprocal %63 {approx = true} : vector<1x8x1xf32> -> vector<1x8x1xf32>
    %65 = vector.broadcast %64 : vector<1x8x1xf32> to vector<1x8x8xf32>
    %66 = arith.mulf %61, %65 : vector<1x8x8xf32>
    %67 = arith.truncf %66 : vector<1x8x8xf32> to vector<1x8x8xbf16>
    %68 = vector.extract_strided_slice %15 {offsets = [0, 0, 16], sizes = [1, 8, 8], strides = [1, 1, 1]} : vector<1x8x32xbf16> to vector<1x8x8xbf16>
    "tpu.trace_start"() <{level = 10 : i32, message = "bqk,bkd->bqd"}> : () -> ()
    %cst_19 = arith.constant dense<0.000000e+00> : vector<1x8x8xf32>
    %69 = tpu.matmul %67, %68, %cst_19 {dimension_numbers = #tpu.dot_dimension_numbers<[2], [1], [1], [2], [0, 0, 0, 1, 1, 2], [0], [0]>} : vector<1x8x8xbf16>, vector<1x8x8xbf16>, vector<1x8x8xf32> -> vector<1x8x8xf32>
    "tpu.trace_stop"() : () -> ()
    %70 = vector.extract_strided_slice %9 {offsets = [0, 0, 24], sizes = [1, 8, 8], strides = [1, 1, 1]} : vector<1x8x32xbf16> to vector<1x8x8xbf16>
    %71 = vector.extract_strided_slice %12 {offsets = [0, 0, 24], sizes = [1, 8, 8], strides = [1, 1, 1]} : vector<1x8x32xbf16> to vector<1x8x8xbf16>
    "tpu.trace_start"() <{level = 10 : i32, message = "bqd,bkd->bqk"}> : () -> ()
    %cst_20 = arith.constant dense<0.000000e+00> : vector<1x8x8xf32>
    %72 = tpu.matmul %70, %71, %cst_20 {dimension_numbers = #tpu.dot_dimension_numbers<[2], [2], [1], [1], [0, 0, 0, 1, 1, 1], [0], [0]>} : vector<1x8x8xbf16>, vector<1x8x8xbf16>, vector<1x8x8xf32> -> vector<1x8x8xf32>
    "tpu.trace_stop"() : () -> ()
    %73 = arith.addf %72, %18 : vector<1x8x8xf32>
    %cst_21 = arith.constant dense<0xFF800000> : vector<1x8xf32>
    %74 = vector.multi_reduction <maximumf>, %73, %cst_21 [2] : vector<1x8x8xf32> to vector<1x8xf32>
    %75 = vector.shape_cast %74 : vector<1x8xf32> to vector<1x8x1xf32>
    %76 = vector.broadcast %75 : vector<1x8x1xf32> to vector<1x8x8xf32>
    %77 = arith.subf %73, %76 : vector<1x8x8xf32>
    %78 = math.exp %77 : vector<1x8x8xf32>
    %cst_22 = arith.constant dense<0.000000e+00> : vector<1x8xf32>
    %79 = vector.multi_reduction <add>, %78, %cst_22 [2] : vector<1x8x8xf32> to vector<1x8xf32>
    %80 = vector.shape_cast %79 : vector<1x8xf32> to vector<1x8x1xf32>
    %81 = tpu.reciprocal %80 {approx = true} : vector<1x8x1xf32> -> vector<1x8x1xf32>
    %82 = vector.broadcast %81 : vector<1x8x1xf32> to vector<1x8x8xf32>
    %83 = arith.mulf %78, %82 : vector<1x8x8xf32>
    %84 = arith.truncf %83 : vector<1x8x8xf32> to vector<1x8x8xbf16>
    %85 = vector.extract_strided_slice %15 {offsets = [0, 0, 24], sizes = [1, 8, 8], strides = [1, 1, 1]} : vector<1x8x32xbf16> to vector<1x8x8xbf16>
    "tpu.trace_start"() <{level = 10 : i32, message = "bqk,bkd->bqd"}> : () -> ()
    %cst_23 = arith.constant dense<0.000000e+00> : vector<1x8x8xf32>
    %86 = tpu.matmul %84, %85, %cst_23 {dimension_numbers = #tpu.dot_dimension_numbers<[2], [1], [1], [2], [0, 0, 0, 1, 1, 2], [0], [0]>} : vector<1x8x8xbf16>, vector<1x8x8xbf16>, vector<1x8x8xf32> -> vector<1x8x8xf32>
    "tpu.trace_stop"() : () -> ()
    %87 = tpu.concatenate %35, %52, %69, %86 in 2 : vector<1x8x8xf32>, vector<1x8x8xf32>, vector<1x8x8xf32>, vector<1x8x8xf32> -> vector<1x8x32xf32>
    %88 = vector.shape_cast %87 : vector<1x8x32xf32> to vector<8x32xf32>
    %89 = arith.addf %88, %0 : vector<8x32xf32>
    %c0_24 = arith.constant 0 : index
    %c0_25 = arith.constant 0 : index
    %90 = vector.load %arg5[%c0_24, %c0_25] : memref<1x32xf32, #tpu.memory_space<vmem>>, vector<1x32xf32>
    %c0_26 = arith.constant 0 : index
    %c0_27 = arith.constant 0 : index
    %91 = vector.load %arg6[%c0_26, %c0_27] : memref<1x32xf32, #tpu.memory_space<vmem>>, vector<1x32xf32>
    %cst_28 = arith.constant dense<0.000000e+00> : vector<8xf32>
    %92 = vector.multi_reduction <add>, %89, %cst_28 [1] : vector<8x32xf32> to vector<8xf32>
    %93 = vector.shape_cast %92 : vector<8xf32> to vector<8x1xf32>
    %cst_29 = arith.constant 3.200000e+01 : f32
    %94 = vector.broadcast %cst_29 : f32 to vector<8x1xf32>
    %95 = arith.divf %93, %94 : vector<8x1xf32>
    %96 = vector.broadcast %95 : vector<8x1xf32> to vector<8x32xf32>
    %97 = arith.subf %89, %96 : vector<8x32xf32>
    %98 = arith.mulf %97, %97 : vector<8x32xf32>
    %cst_30 = arith.constant dense<0.000000e+00> : vector<8xf32>
    %99 = vector.multi_reduction <add>, %98, %cst_30 [1] : vector<8x32xf32> to vector<8xf32>
    %100 = vector.shape_cast %99 : vector<8xf32> to vector<8x1xf32>
    %cst_31 = arith.constant 3.200000e+01 : f32
    %101 = vector.broadcast %cst_31 : f32 to vector<8x1xf32>
    %102 = arith.divf %100, %101 : vector<8x1xf32>
    %103 = vector.broadcast %95 : vector<8x1xf32> to vector<8x32xf32>
    %104 = arith.subf %89, %103 : vector<8x32xf32>
    %cst_32 = arith.constant 9.99999974E-6 : f32
    %105 = vector.broadcast %cst_32 : f32 to vector<8x1xf32>
    %106 = arith.addf %102, %105 : vector<8x1xf32>
    %107 = math.rsqrt %106 : vector<8x1xf32>
    %108 = vector.broadcast %107 : vector<8x1xf32> to vector<8x32xf32>
    %109 = arith.mulf %104, %108 : vector<8x32xf32>
    %110 = vector.broadcast %90 : vector<1x32xf32> to vector<8x32xf32>
    %111 = arith.mulf %109, %110 : vector<8x32xf32>
    %112 = vector.broadcast %91 : vector<1x32xf32> to vector<8x32xf32>
    %113 = arith.addf %111, %112 : vector<8x32xf32>
    %114 = arith.truncf %113 : vector<8x32xf32> to vector<8x32xbf16>
    %c0_33 = arith.constant 0 : index
    %c0_34 = arith.constant 0 : index
    %115 = vector.load %arg7[%c0_33, %c0_34] : memref<32x64xbf16, #tpu.memory_space<vmem>>, vector<32x64xbf16>
    %cst_35 = arith.constant dense<0.000000e+00> : vector<8x64xf32>
    %116 = tpu.matmul %114, %115, %cst_35 {dimension_numbers = #tpu.dot_dimension_numbers<[1], [0], [0], [1], [0, 0, 1, 1], [], []>} : vector<8x32xbf16>, vector<32x64xbf16>, vector<8x64xf32> -> vector<8x64xf32>
    %c0_36 = arith.constant 0 : index
    %c0_37 = arith.constant 0 : index
    %117 = vector.load %arg8[%c0_36, %c0_37] : memref<1x64xf32, #tpu.memory_space<vmem>>, vector<1x64xf32>
    %118 = vector.broadcast %117 : vector<1x64xf32> to vector<8x64xf32>
    %119 = arith.addf %116, %118 : vector<8x64xf32>
    %cst_38 = arith.constant 0.000000e+00 : f32
    %120 = vector.broadcast %cst_38 : f32 to vector<8x64xf32>
    %121 = arith.maximumf %119, %120 : vector<8x64xf32>
    %122 = arith.truncf %121 : vector<8x64xf32> to vector<8x64xbf16>
    %c0_39 = arith.constant 0 : index
    %c0_40 = arith.constant 0 : index
    %123 = vector.load %arg9[%c0_39, %c0_40] : memref<64x32xbf16, #tpu.memory_space<vmem>>, vector<64x32xbf16>
    %cst_41 = arith.constant dense<0.000000e+00> : vector<8x32xf32>
    %124 = tpu.matmul %122, %123, %cst_41 {dimension_numbers = #tpu.dot_dimension_numbers<[1], [0], [0], [1], [0, 0, 1, 1], [], []>} : vector<8x64xbf16>, vector<64x32xbf16>, vector<8x32xf32> -> vector<8x32xf32>
    %c0_42 = arith.constant 0 : index
    %c0_43 = arith.constant 0 : index
    %125 = vector.load %arg10[%c0_42, %c0_43] : memref<1x32xf32, #tpu.memory_space<vmem>>, vector<1x32xf32>
    %126 = vector.broadcast %125 : vector<1x32xf32> to vector<8x32xf32>
    %127 = arith.addf %124, %126 : vector<8x32xf32>
    %128 = arith.addf %127, %113 : vector<8x32xf32>
    %c0_44 = arith.constant 0 : index
    %c0_45 = arith.constant 0 : index
    %129 = vector.load %arg11[%c0_44, %c0_45] : memref<1x32xf32, #tpu.memory_space<vmem>>, vector<1x32xf32>
    %c0_46 = arith.constant 0 : index
    %c0_47 = arith.constant 0 : index
    %130 = vector.load %arg12[%c0_46, %c0_47] : memref<1x32xf32, #tpu.memory_space<vmem>>, vector<1x32xf32>
    %cst_48 = arith.constant dense<0.000000e+00> : vector<8xf32>
    %131 = vector.multi_reduction <add>, %128, %cst_48 [1] : vector<8x32xf32> to vector<8xf32>
    %132 = vector.shape_cast %131 : vector<8xf32> to vector<8x1xf32>
    %cst_49 = arith.constant 3.200000e+01 : f32
    %133 = vector.broadcast %cst_49 : f32 to vector<8x1xf32>
    %134 = arith.divf %132, %133 : vector<8x1xf32>
    %135 = vector.broadcast %134 : vector<8x1xf32> to vector<8x32xf32>
    %136 = arith.subf %128, %135 : vector<8x32xf32>
    %137 = arith.mulf %136, %136 : vector<8x32xf32>
    %cst_50 = arith.constant dense<0.000000e+00> : vector<8xf32>
    %138 = vector.multi_reduction <add>, %137, %cst_50 [1] : vector<8x32xf32> to vector<8xf32>
    %139 = vector.shape_cast %138 : vector<8xf32> to vector<8x1xf32>
    %cst_51 = arith.constant 3.200000e+01 : f32
    %140 = vector.broadcast %cst_51 : f32 to vector<8x1xf32>
    %141 = arith.divf %139, %140 : vector<8x1xf32>
    %142 = vector.broadcast %134 : vector<8x1xf32> to vector<8x32xf32>
    %143 = arith.subf %128, %142 : vector<8x32xf32>
    %cst_52 = arith.constant 9.99999974E-6 : f32
    %144 = vector.broadcast %cst_52 : f32 to vector<8x1xf32>
    %145 = arith.addf %141, %144 : vector<8x1xf32>
    %146 = math.rsqrt %145 : vector<8x1xf32>
    %147 = vector.broadcast %146 : vector<8x1xf32> to vector<8x32xf32>
    %148 = arith.mulf %143, %147 : vector<8x32xf32>
    %149 = vector.broadcast %129 : vector<1x32xf32> to vector<8x32xf32>
    %150 = arith.mulf %148, %149 : vector<8x32xf32>
    %151 = vector.broadcast %130 : vector<1x32xf32> to vector<8x32xf32>
    %152 = arith.addf %150, %151 : vector<8x32xf32>
    %c0_53 = arith.constant 0 : index
    %c0_54 = arith.constant 0 : index
    %153 = vector.load %arg13[%c0_53, %c0_54] : memref<8x32xf32, #tpu.memory_space<vmem>>, vector<8x32xf32>
    tpu.vector_store %arg13[%c0_53, %c0_54], %152 {strides = array<i32>} : memref<8x32xf32, #tpu.memory_space<vmem>>, vector<8x32xf32>,
    return
  }
  func.func @transform_0(%arg0: i32) -> (i32, i32) {
    %c0_i32 = arith.constant 0 : i32
    %c0_i32_0 = arith.constant 0 : i32
    return %arg0, %c0_i32 : i32, i32
  }
  func.func @transform_1(%arg0: i32) -> (i32, i32, i32) {
    %c0_i32 = arith.constant 0 : i32
    %c0_i32_0 = arith.constant 0 : i32
    %c0_i32_1 = arith.constant 0 : i32
    return %arg0, %c0_i32, %c0_i32_0 : i32, i32, i32
  }
  func.func @transform_2(%arg0: i32) -> (i32, i32) {
    %c0_i32 = arith.constant 0 : i32
    %c0_i32_0 = arith.constant 0 : i32
    %c0_i32_1 = arith.constant 0 : i32
    return %c0_i32, %c0_i32_0 : i32, i32
  }
  func.func @transform_3(%arg0: i32) -> (i32, i32) {
    %c0_i32 = arith.constant 0 : i32
    %c0_i32_0 = arith.constant 0 : i32
    %c0_i32_1 = arith.constant 0 : i32
    return %c0_i32, %c0_i32_0 : i32, i32
  }
  func.func @transform_4(%arg0: i32) -> (i32, i32) {
    %c0_i32 = arith.constant 0 : i32
    %c0_i32_0 = arith.constant 0 : i32
    %c0_i32_1 = arith.constant 0 : i32
    return %c0_i32, %c0_i32_0 : i32, i32
  }
  func.func @transform_5(%arg0: i32) -> (i32, i32) {
    %c0_i32 = arith.constant 0 : i32
    %c0_i32_0 = arith.constant 0 : i32
    %c0_i32_1 = arith.constant 0 : i32
    return %c0_i32, %c0_i32_0 : i32, i32
  }
  func.func @transform_6(%arg0: i32) -> (i32, i32) {
    %c0_i32 = arith.constant 0 : i32
    %c0_i32_0 = arith.constant 0 : i32
    %c0_i32_1 = arith.constant 0 : i32
    return %c0_i32, %c0_i32_0 : i32, i32
  }
  func.func @transform_7(%arg0: i32) -> (i32, i32) {
    %c0_i32 = arith.constant 0 : i32
    %c0_i32_0 = arith.constant 0 : i32
    %c0_i32_1 = arith.constant 0 : i32
    return %c0_i32, %c0_i32_0 : i32, i32
  }
  func.func @transform_8(%arg0: i32) -> (i32, i32) {
    %c0_i32 = arith.constant 0 : i32
    %c0_i32_0 = arith.constant 0 : i32
    %c0_i32_1 = arith.constant 0 : i32
    return %c0_i32, %c0_i32_0 : i32, i32
  }
  func.func @transform_9(%arg0: i32) -> (i32, i32) {
    %c0_i32 = arith.constant 0 : i32
    %c0_i32_0 = arith.constant 0 : i32
    %c0_i32_1 = arith.constant 0 : i32
    return %c0_i32, %c0_i32_0 : i32, i32
  }
  func.func @transform_10(%arg0: i32) -> (i32, i32) {
    %c0_i32 = arith.constant 0 : i32
    %c0_i32_0 = arith.constant 0 : i32
    %c0_i32_1 = arith.constant 0 : i32
    return %c0_i32, %c0_i32_0 : i32, i32
  }
  func.func @transform_11(%arg0: i32) -> (i32, i32) {
    %c0_i32 = arith.constant 0 : i32
    %c0_i32_0 = arith.constant 0 : i32
    %c0_i32_1 = arith.constant 0 : i32
    return %c0_i32, %c0_i32_0 : i32, i32
  }
  func.func @transform_12(%arg0: i32) -> (i32, i32) {
    %c0_i32 = arith.constant 0 : i32
    %c0_i32_0 = arith.constant 0 : i32
    return %arg0, %c0_i32 : i32, i32
  }
}

module attributes {stable_mosaic.version = 11 : i64} {
  func.func @encoder_kernel(%arg0: i32, %arg1: memref<8x32xf32, #tpu.memory_space<vmem>>, %arg2: memref<1x1x8xf32, #tpu.memory_space<vmem>>, %arg3: memref<32x96xbf16, #tpu.memory_space<vmem>>, %arg4: memref<1x96xf32, #tpu.memory_space<vmem>>, %arg5: memref<1x32xf32, #tpu.memory_space<vmem>>, %arg6: memref<1x32xf32, #tpu.memory_space<vmem>>, %arg7: memref<32x64xbf16, #tpu.memory_space<vmem>>, %arg8: memref<1x64xf32, #tpu.memory_space<vmem>>, %arg9: memref<64x32xbf16, #tpu.memory_space<vmem>>, %arg10: memref<1x32xf32, #tpu.memory_space<vmem>>, %arg11: memref<1x32xf32, #tpu.memory_space<vmem>>, %arg12: memref<1x32xf32, #tpu.memory_space<vmem>>, %arg13: memref<8x32xf32, #tpu.memory_space<vmem>>) attributes {dimension_semantics = [#tpu.dimension_semantics<parallel>], iteration_bounds = array<i64: 2>, scalar_prefetch = 0 : i64, scratch_operands = 0 : i64, tpu.core_type = #tpu.core_type<tc>, window_params = [{transform_indices = @transform_0, window_bounds = array<i64: 8, 32>}, {transform_indices = @transform_1, window_bounds = array<i64: 1, 1, 8>}, {pipeline_mode = #tpu.pipeline_mode<synchronous>, transform_indices = @transform_2, window_bounds = array<i64: 32, 96>}, {pipeline_mode = #tpu.pipeline_mode<synchronous>, transform_indices = @transform_3, window_bounds = array<i64: 1, 96>}, {pipeline_mode = #tpu.pipeline_mode<synchronous>, transform_indices = @transform_4, window_bounds = array<i64: 1, 32>}, {pipeline_mode = #tpu.pipeline_mode<synchronous>, transform_indices = @transform_5, window_bounds = array<i64: 1, 32>}, {pipeline_mode = #tpu.pipeline_mode<synchronous>, transform_indices = @transform_6, window_bounds = array<i64: 32, 64>}, {pipeline_mode = #tpu.pipeline_mode<synchronous>, transform_indices = @transform_7, window_bounds = array<i64: 1, 64>}, {pipeline_mode = #tpu.pipeline_mode<synchronous>, transform_indices = @transform_8, window_bounds = array<i64: 64, 32>}, {pipeline_mode = #tpu.pipeline_mode<synchronous>, transform_indices = @transform_9, window_bounds = array<i64: 1, 32>}, {pipeline_mode = #tpu.pipeline_mode<synchronous>, transform_indices = @transform_10, window_bounds = array<i64: 1, 32>}, {pipeline_mode = #tpu.pipeline_mode<synchronous>, transform_indices = @transform_11, window_bounds = array<i64: 1, 32>}, {transform_indices = @transform_12, window_bounds = array<i64: 8, 32>}]} {
    %c0 = arith.constant 0 : index
    %c0_0 = arith.constant 0 : index
    %0 = vector.load %arg1[%c0, %c0_0] : memref<8x32xf32, #tpu.memory_space<vmem>>, vector<8x32xf32>
    %1 = arith.truncf %0 : vector<8x32xf32> to vector<8x32xbf16>
    %c0_1 = arith.constant 0 : index
    %c0_2 = arith.constant 0 : index
    %2 = vector.load %arg3[%c0_1, %c0_2] : memref<32x96xbf16, #tpu.memory_space<vmem>>, vector<32x96xbf16>
    %cst = arith.constant dense<0.000000e+00> : vector<8x96xf32>
    %3 = tpu.matmul %1, %2, %cst {dimension_numbers = #tpu.dot_dimension_numbers<[1], [0], [0], [1], [0, 0, 1, 1], [], []>} : vector<8x32xbf16>, vector<32x96xbf16>, vector<8x96xf32> -> vector<8x96xf32>
    %c0_3 = arith.constant 0 : index
    %c0_4 = arith.constant 0 : index
    %4 = vector.load %arg4[%c0_3, %c0_4] : memref<1x96xf32, #tpu.memory_space<vmem>>, vector<1x96xf32>
    %5 = vector.broadcast %4 : vector<1x96xf32> to vector<8x96xf32>
    %6 = arith.addf %3, %5 : vector<8x96xf32>
    %7 = vector.extract_strided_slice %6 {offsets = [0, 0], sizes = [8, 32], strides = [1, 1]} : vector<8x96xf32> to vector<8x32xf32>
    %8 = vector.shape_cast %7 : vector<8x32xf32> to vector<1x8x32xf32>
    %9 = arith.truncf %8 : vector<1x8x32xf32> to vector<1x8x32xbf16>
    %10 = vector.extract_strided_slice %6 {offsets = [0, 32], sizes = [8, 32], strides = [1, 1]} : vector<8x96xf32> to vector<8x32xf32>
    %11 = vector.shape_cast %10 : vector<8x32xf32> to vector<1x8x32xf32>
    %12 = arith.truncf %11 : vector<1x8x32xf32> to vector<1x8x32xbf16>
    %13 = vector.extract_strided_slice %6 {offsets = [0, 64], sizes = [8, 32], strides = [1, 1]} : vector<8x96xf32> to vector<8x32xf32>
    %14 = vector.shape_cast %13 : vector<8x32xf32> to vector<1x8x32xf32>
    %15 = arith.truncf %14 : vector<1x8x32xf32> to vector<1x8x32xbf16>
    %c0_5 = arith.constant 0 : index
    %c0_6 = arith.constant 0 : index
    %c0_7 = arith.constant 0 : index
    %16 = vector.load %arg2[%c0_5, %c0_6, %c0_7] : memref<1x1x8xf32, #tpu.memory_space<vmem>>, vector<1x1x8xf32>
    %17 = vector.shape_cast %16 : vector<1x1x8xf32> to vector<1x1x8xf32>
    %18 = vector.broadcast %17 : vector<1x1x8xf32> to vector<1x8x8xf32>
    %19 = vector.extract_strided_slice %9 {offsets = [0, 0, 0], sizes = [1, 8, 8], strides = [1, 1, 1]} : vector<1x8x32xbf16> to vector<1x8x8xbf16>
    %20 = vector.extract_strided_slice %12 {offsets = [0, 0, 0], sizes = [1, 8, 8], strides = [1, 1, 1]} : vector<1x8x32xbf16> to vector<1x8x8xbf16>
    "tpu.trace_start"() <{level = 10 : i32, message = "bqd,bkd->bqk"}> : () -> ()
    %cst_8 = arith.constant dense<0.000000e+00> : vector<1x8x8xf32>
    %21 = tpu.matmul %19, %20, %cst_8 {dimension_numbers = #tpu.dot_dimension_numbers<[2], [2], [1], [1], [0, 0, 0, 1, 1, 1], [0], [0]>} : vector<1x8x8xbf16>, vector<1x8x8xbf16>, vector<1x8x8xf32> -> vector<1x8x8xf32>
    "tpu.trace_stop"() : () -> ()
    %22 = arith.addf %21, %18 : vector<1x8x8xf32>
    %cst_9 = arith.constant dense<0xFF800000> : vector<1x8xf32>
    %23 = vector.multi_reduction <maximumf>, %22, %cst_9 [2] : vector<1x8x8xf32> to vector<1x8xf32>
    %24 = vector.shape_cast %23 : vector<1x8xf32> to vector<1x8x1xf32>
    %25 = vector.broadcast %24 : vector<1x8x1xf32> to vector<1x8x8xf32>
    %26 = arith.subf %22, %25 : vector<1x8x8xf32>
    %27 = math.exp %26 : vector<1x8x8xf32>
    %cst_10 = arith.constant dense<0.000000e+00> : vector<1x8xf32>
    %28 = vector.multi_reduction <add>, %27, %cst_10 [2] : vector<1x8x8xf32> to vector<1x8xf32>
    %29 = vector.shape_cast %28 : vector<1x8xf32> to vector<1x8x1xf32>
    %30 = tpu.reciprocal %29 {approx = true} : vector<1x8x1xf32> -> vector<1x8x1xf32>
    %31 = vector.broadcast %30 : vector<1x8x1xf32> to vector<1x8x8xf32>
    %32 = arith.mulf %27, %31 : vector<1x8x8xf32>
    %33 = arith.truncf %32 : vector<1x8x8xf32> to vector<1x8x8xbf16>
    %34 = vector.extract_strided_slice %15 {offsets = [0, 0, 0], sizes = [1, 8, 8], strides = [1, 1, 1]} : vector<1x8x32xbf16> to vector<1x8x8xbf16>
    "tpu.trace_start"() <{level = 10 : i32, message = "bqk,bkd->bqd"}> : () -> ()
    %cst_11 = arith.constant dense<0.000000e+00> : vector<1x8x8xf32>
    %35 = tpu.matmul %33, %34, %cst_11 {dimension_numbers = #tpu.dot_dimension_numbers<[2], [1], [1], [2], [0, 0, 0, 1, 1, 2], [0], [0]>} : vector<1x8x8xbf16>, vector<1x8x8xbf16>, vector<1x8x8xf32> -> vector<1x8x8xf32>
    "tpu.trace_stop"() : () -> ()
    %36 = vector.extract_strided_slice %9 {offsets = [0, 0, 8], sizes = [1, 8, 8], strides = [1, 1, 1]} : vector<1x8x32xbf16> to vector<1x8x8xbf16>
    %37 = vector.extract_strided_slice %12 {offsets = [0, 0, 8], sizes = [1, 8, 8], strides = [1, 1, 1]} : vector<1x8x32xbf16> to vector<1x8x8xbf16>
    "tpu.trace_start"() <{level = 10 : i32, message = "bqd,bkd->bqk"}> : () -> ()
    %cst_12 = arith.constant dense<0.000000e+00> : vector<1x8x8xf32>
    %38 = tpu.matmul %36, %37, %cst_12 {dimension_numbers = #tpu.dot_dimension_numbers<[2], [2], [1], [1], [0, 0, 0, 1, 1, 1], [0], [0]>} : vector<1x8x8xbf16>, vector<1x8x8xbf16>, vector<1x8x8xf32> -> vector<1x8x8xf32>
    "tpu.trace_stop"() : () -> ()
    %39 = arith.addf %38, %18 : vector<1x8x8xf32>
    %cst_13 = arith.constant dense<0xFF800000> : vector<1x8xf32>
    %40 = vector.multi_reduction <maximumf>, %39, %cst_13 [2] : vector<1x8x8xf32> to vector<1x8xf32>
    %41 = vector.shape_cast %40 : vector<1x8xf32> to vector<1x8x1xf32>
    %42 = vector.broadcast %41 : vector<1x8x1xf32> to vector<1x8x8xf32>
    %43 = arith.subf %39, %42 : vector<1x8x8xf32>
    %44 = math.exp %43 : vector<1x8x8xf32>
    %cst_14 = arith.constant dense<0.000000e+00> : vector<1x8xf32>
    %45 = vector.multi_reduction <add>, %44, %cst_14 [2] : vector<1x8x8xf32> to vector<1x8xf32>
    %46 = vector.shape_cast %45 : vector<1x8xf32> to vector<1x8x1xf32>
    %47 = tpu.reciprocal %46 {approx = true} : vector<1x8x1xf32> -> vector<1x8x1xf32>
    %48 = vector.broadcast %47 : vector<1x8x1xf32> to vector<1x8x8xf32>
    %49 = arith.mulf %44, %48 : vector<1x8x8xf32>
    %50 = arith.truncf %49 : vector<1x8x8xf32> to vector<1x8x8xbf16>
    %51 = vector.extract_strided_slice %15 {offsets = [0, 0, 8], sizes = [1, 8, 8], strides = [1, 1, 1]} : vector<1x8x32xbf16> to vector<1x8x8xbf16>
    "tpu.trace_start"() <{level = 10 : i32, message = "bqk,bkd->bqd"}> : () -> ()
    %cst_15 = arith.constant dense<0.000000e+00> : vector<1x8x8xf32>
    %52 = tpu.matmul %50, %51, %cst_15 {dimension_numbers = #tpu.dot_dimension_numbers<[2], [1], [1], [2], [0, 0, 0, 1, 1, 2], [0], [0]>} : vector<1x8x8xbf16>, vector<1x8x8xbf16>, vector<1x8x8xf32> -> vector<1x8x8xf32>
    "tpu.trace_stop"() : () -> ()
    %53 = vector.extract_strided_slice %9 {offsets = [0, 0, 16], sizes = [1, 8, 8], strides = [1, 1, 1]} : vector<1x8x32xbf16> to vector<1x8x8xbf16>
    %54 = vector.extract_strided_slice %12 {offsets = [0, 0, 16], sizes = [1, 8, 8], strides = [1, 1, 1]} : vector<1x8x32xbf16> to vector<1x8x8xbf16>
    "tpu.trace_start"() <{level = 10 : i32, message = "bqd,bkd->bqk"}> : () -> ()
    %cst_16 = arith.constant dense<0.000000e+00> : vector<1x8x8xf32>
    %55 = tpu.matmul %53, %54, %cst_16 {dimension_numbers = #tpu.dot_dimension_numbers<[2], [2], [1], [1], [0, 0, 0, 1, 1, 1], [0], [0]>} : vector<1x8x8xbf16>, vector<1x8x8xbf16>, vector<1x8x8xf32> -> vector<1x8x8xf32>
    "tpu.trace_stop"() : () -> ()
    %56 = arith.addf %55, %18 : vector<1x8x8xf32>
    %cst_17 = arith.constant dense<0xFF800000> : vector<1x8xf32>
    %57 = vector.multi_reduction <maximumf>, %56, %cst_17 [2] : vector<1x8x8xf32> to vector<1x8xf32>
    %58 = vector.shape_cast %57 : vector<1x8xf32> to vector<1x8x1xf32>
    %59 = vector.broadcast %58 : vector<1x8x1xf32> to vector<1x8x8xf32>
    %60 = arith.subf %56, %59 : vector<1x8x8xf32>
    %61 = math.exp %60 : vector<1x8x8xf32>
    %cst_18 = arith.constant dense<0.000000e+00> : vector<1x8xf32>
    %62 = vector.multi_reduction <add>, %61, %cst_18 [2] : vector<1x8x8xf32> to vector<1x8xf32>
    %63 = vector.shape_cast %62 : vector<1x8xf32> to vector<1x8x1xf32>
    %64 = tpu.reciprocal %63 {approx = true} : vector<1x8x1xf32> -> vector<1x8x1xf32>
    %65 = vector.broadcast %64 : vector<1x8x1xf32> to vector<1x8x8xf32>
    %66 = arith.mulf %61, %65 : vector<1x8x8xf32>
    %67 = arith.truncf %66 : vector<1x8x8xf32> to vector<1x8x8xbf16>
    %68 = vector.extract_strided_slice %15 {offsets = [0, 0, 16], sizes = [1, 8, 8], strides = [1, 1, 1]} : vector<1x8x32xbf16> to vector<1x8x8xbf16>
    "tpu.trace_start"() <{level = 10 : i32, message = "bqk,bkd->bqd"}> : () -> ()
    %cst_19 = arith.constant dense<0.000000e+00> : vector<1x8x8xf32>
    %69 = tpu.matmul %67, %68, %cst_19 {dimension_numbers = #tpu.dot_dimension_numbers<[2], [1], [1], [2], [0, 0, 0, 1, 1, 2], [0], [0]>} : vector<1x8x8xbf16>, vector<1x8x8xbf16>, vector<1x8x8xf32> -> vector<1x8x8xf32>
    "tpu.trace_stop"() : () -> ()
    %70 = vector.extract_strided_slice %9 {offsets = [0, 0, 24], sizes = [1, 8, 8], strides = [1, 1, 1]} : vector<1x8x32xbf16> to vector<1x8x8xbf16>
    %71 = vector.extract_strided_slice %12 {offsets = [0, 0, 24], sizes = [1, 8, 8], strides = [1, 1, 1]} : vector<1x8x32xbf16> to vector<1x8x8xbf16>
    "tpu.trace_start"() <{level = 10 : i32, message = "bqd,bkd->bqk"}> : () -> ()
    %cst_20 = arith.constant dense<0.000000e+00> : vector<1x8x8xf32>
    %72 = tpu.matmul %70, %71, %cst_20 {dimension_numbers = #tpu.dot_dimension_numbers<[2], [2], [1], [1], [0, 0, 0, 1, 1, 1], [0], [0]>} : vector<1x8x8xbf16>, vector<1x8x8xbf16>, vector<1x8x8xf32> -> vector<1x8x8xf32>
    "tpu.trace_stop"() : () -> ()
    %73 = arith.addf %72, %18 : vector<1x8x8xf32>
    %cst_21 = arith.constant dense<0xFF800000> : vector<1x8xf32>
    %74 = vector.multi_reduction <maximumf>, %73, %cst_21 [2] : vector<1x8x8xf32> to vector<1x8xf32>
    %75 = vector.shape_cast %74 : vector<1x8xf32> to vector<1x8x1xf32>
    %76 = vector.broadcast %75 : vector<1x8x1xf32> to vector<1x8x8xf32>
    %77 = arith.subf %73, %76 : vector<1x8x8xf32>
    %78 = math.exp %77 : vector<1x8x8xf32>
    %cst_22 = arith.constant dense<0.000000e+00> : vector<1x8xf32>
    %79 = vector.multi_reduction <add>, %78, %cst_22 [2] : vector<1x8x8xf32> to vector<1x8xf32>
    %80 = vector.shape_cast %79 : vector<1x8xf32> to vector<1x8x1xf32>
    %81 = tpu.reciprocal %80 {approx = true} : vector<1x8x1xf32> -> vector<1x8x1xf32>
    %82 = vector.broadcast %81 : vector<1x8x1xf32> to vector<1x8x8xf32>
    %83 = arith.mulf %78, %82 : vector<1x8x8xf32>
    %84 = arith.truncf %83 : vector<1x8x8xf32> to vector<1x8x8xbf16>
    %85 = vector.extract_strided_slice %15 {offsets = [0, 0, 24], sizes = [1, 8, 8], strides = [1, 1, 1]} : vector<1x8x32xbf16> to vector<1x8x8xbf16>
    "tpu.trace_start"() <{level = 10 : i32, message = "bqk,bkd->bqd"}> : () -> ()
    %cst_23 = arith.constant dense<0.000000e+00> : vector<1x8x8xf32>
    %86 = tpu.matmul %84, %85, %cst_23 {dimension_numbers = #tpu.dot_dimension_numbers<[2], [1], [1], [2], [0, 0, 0, 1, 1, 2], [0], [0]>} : vector<1x8x8xbf16>, vector<1x8x8xbf16>, vector<1x8x8xf32> -> vector<1x8x8xf32>
    "tpu.trace_stop"() : () -> ()
    %87 = tpu.concatenate %35, %52, %69, %86 in 2 : vector<1x8x8xf32>, vector<1x8x8xf32>, vector<1x8x8xf32>, vector<1x8x8xf32> -> vector<1x8x32xf32>
    %88 = vector.shape_cast %87 : vector<1x8x32xf32> to vector<8x32xf32>
    %89 = arith.addf %88, %0 : vector<8x32xf32>
    %c0_24 = arith.constant 0 : index
    %c0_25 = arith.constant 0 : index
    %90 = vector.load %arg5[%c0_24, %c0_25] : memref<1x32xf32, #tpu.memory_space<vmem>>, vector<1x32xf32>
    %c0_26 = arith.constant 0 : index
    %c0_27 = arith.constant 0 : index
    %91 = vector.load %arg6[%c0_26, %c0_27] : memref<1x32xf32, #tpu.memory_space<vmem>>, vector<1x32xf32>
    %cst_28 = arith.constant dense<0.000000e+00> : vector<8xf32>
    %92 = vector.multi_reduction <add>, %89, %cst_28 [1] : vector<8x32xf32> to vector<8xf32>
    %93 = vector.shape_cast %92 : vector<8xf32> to vector<8x1xf32>
    %cst_29 = arith.constant 3.200000e+01 : f32
    %94 = vector.broadcast %cst_29 : f32 to vector<8x1xf32>
    %95 = arith.divf %93, %94 : vector<8x1xf32>
    %96 = vector.broadcast %95 : vector<8x1xf32> to vector<8x32xf32>
    %97 = arith.subf %89, %96 : vector<8x32xf32>
    %98 = arith.mulf %97, %97 : vector<8x32xf32>
    %cst_30 = arith.constant dense<0.000000e+00> : vector<8xf32>
    %99 = vector.multi_reduction <add>, %98, %cst_30 [1] : vector<8x32xf32> to vector<8xf32>
    %100 = vector.shape_cast %99 : vector<8xf32> to vector<8x1xf32>
    %cst_31 = arith.constant 3.200000e+01 : f32
    %101 = vector.broadcast %cst_31 : f32 to vector<8x1xf32>
    %102 = arith.divf %100, %101 : vector<8x1xf32>
    %103 = vector.broadcast %95 : vector<8x1xf32> to vector<8x32xf32>
    %104 = arith.subf %89, %103 : vector<8x32xf32>
    %cst_32 = arith.constant 9.99999974E-6 : f32
    %105 = vector.broadcast %cst_32 : f32 to vector<8x1xf32>
    %106 = arith.addf %102, %105 : vector<8x1xf32>
    %107 = math.rsqrt %106 : vector<8x1xf32>
    %108 = vector.broadcast %107 : vector<8x1xf32> to vector<8x32xf32>
    %109 = arith.mulf %104, %108 : vector<8x32xf32>
    %110 = vector.broadcast %90 : vector<1x32xf32> to vector<8x32xf32>
    %111 = arith.mulf %109, %110 : vector<8x32xf32>
    %112 = vector.broadcast %91 : vector<1x32xf32> to vector<8x32xf32>
    %113 = arith.addf %111, %112 : vector<8x32xf32>
    %114 = arith.truncf %113 : vector<8x32xf32> to vector<8x32xbf16>
    %c0_33 = arith.constant 0 : index
    %c0_34 = arith.constant 0 : index
    %115 = vector.load %arg7[%c0_33, %c0_34] : memref<32x64xbf16, #tpu.memory_space<vmem>>, vector<32x64xbf16>
    %cst_35 = arith.constant dense<0.000000e+00> : vector<8x64xf32>
    %116 = tpu.matmul %114, %115, %cst_35 {dimension_numbers = #tpu.dot_dimension_numbers<[1], [0], [0], [1], [0, 0, 1, 1], [], []>} : vector<8x32xbf16>, vector<32x64xbf16>, vector<8x64xf32> -> vector<8x64xf32>
    %c0_36 = arith.constant 0 : index
    %c0_37 = arith.constant 0 : index
    %117 = vector.load %arg8[%c0_36, %c0_37] : memref<1x64xf32, #tpu.memory_space<vmem>>, vector<1x64xf32>
    %118 = vector.broadcast %117 : vector<1x64xf32> to vector<8x64xf32>
    %119 = arith.addf %116, %118 : vector<8x64xf32>
    %cst_38 = arith.constant 0.000000e+00 : f32
    %120 = vector.broadcast %cst_38 : f32 to vector<8x64xf32>
    %121 = arith.maximumf %119, %120 : vector<8x64xf32>
    %122 = arith.truncf %121 : vector<8x64xf32> to vector<8x64xbf16>
    %c0_39 = arith.constant 0 : index
    %c0_40 = arith.constant 0 : index
    %123 = vector.load %arg9[%c0_39, %c0_40] : memref<64x32xbf16, #tpu.memory_space<vmem>>, vector<64x32xbf16>
    %cst_41 = arith.constant dense<0.000000e+00> : vector<8x32xf32>
    %124 = tpu.matmul %122, %123, %cst_41 {dimension_numbers = #tpu.dot_dimension_numbers<[1], [0], [0], [1], [0, 0, 1, 1], [], []>} : vector<8x64xbf16>, vector<64x32xbf16>, vector<8x32xf32> -> vector<8x32xf32>
    %c0_42 = arith.constant 0 : index
    %c0_43 = arith.constant 0 : index
    %125 = vector.load %arg10[%c0_42, %c0_43] : memref<1x32xf32, #tpu.memory_space<vmem>>, vector<1x32xf32>
    %126 = vector.broadcast %125 : vector<1x32xf32> to vector<8x32xf32>
    %127 = arith.addf %124, %126 : vector<8x32xf32>
    %128 = arith.addf %127, %113 : vector<8x32xf32>
    %c0_44 = arith.constant 0 : index
    %c0_45 = arith.constant 0 : index
    %129 = vector.load %arg11[%c0_44, %c0_45] : memref<1x32xf32, #tpu.memory_space<vmem>>, vector<1x32xf32>
    %c0_46 = arith.constant 0 : index
    %c0_47 = arith.constant 0 : index
    %130 = vector.load %arg12[%c0_46, %c0_47] : memref<1x32xf32, #tpu.memory_space<vmem>>, vector<1x32xf32>
    %cst_48 = arith.constant dense<0.000000e+00> : vector<8xf32>
    %131 = vector.multi_reduction <add>, %128, %cst_48 [1] : vector<8x32xf32> to vector<8xf32>
    %132 = vector.shape_cast %131 : vector<8xf32> to vector<8x1xf32>
    %cst_49 = arith.constant 3.200000e+01 : f32
    %133 = vector.broadcast %cst_49 : f32 to vector<8x1xf32>
    %134 = arith.divf %132, %133 : vector<8x1xf32>
    %135 = vector.broadcast %134 : vector<8x1xf32> to vector<8x32xf32>
    %136 = arith.subf %128, %135 : vector<8x32xf32>
    %137 = arith.mulf %136, %136 : vector<8x32xf32>
    %cst_50 = arith.constant dense<0.000000e+00> : vector<8xf32>
    %138 = vector.multi_reduction <add>, %137, %cst_50 [1] : vector<8x32xf32> to vector<8xf32>
    %139 = vector.shape_cast %138 : vector<8xf32> to vector<8x1xf32>
    %cst_51 = arith.constant 3.200000e+01 : f32
    %140 = vector.broadcast %cst_51 : f32 to vector<8x1xf32>
    %141 = arith.divf %139, %140 : vector<8x1xf32>
    %142 = vector.broadcast %134 : vector<8x1xf32> to vector<8x32xf32>
    %143 = arith.subf %128, %142 : vector<8x32xf32>
    %cst_52 = arith.constant 9.99999974E-6 : f32
    %144 = vector.broadcast %cst_52 : f32 to vector<8x1xf32>
    %145 = arith.addf %141, %144 : vector<8x1xf32>
    %146 = math.rsqrt %145 : vector<8x1xf32>
    %147 = vector.broadcast %146 : vector<8x1xf32> to vector<8x32xf32>
    %148 = arith.mulf %143, %147 : vector<8x32xf32>
    %149 = vector.broadcast %129 : vector<1x32xf32> to vector<8x32xf32>
    %150 = arith.mulf %148, %149 : vector<8x32xf32>
    %151 = vector.broadcast %130 : vector<1x32xf32> to vector<8x32xf32>
    %152 = arith.addf %150, %151 : vector<8x32xf32>
    %c0_53 = arith.constant 0 : index
    %c0_54 = arith.constant 0 : index
    %153 = vector.load %arg13[%c0_53, %c0_54] : memref<8x32xf32, #tpu.memory_space<vmem>>, vector<8x32xf32>
    tpu.vector_store %arg13[%c0_53, %c0_54], %152 {strides = array<i32>} : memref<8x32xf32, #tpu.memory_space<vmem>>, vector<8x32xf32>,
    return
  }
  func.func @transform_0(%arg0: i32) -> (i32, i32) {
    %c0_i32 = arith.constant 0 : i32
    %c0_i32_0 = arith.constant 0 : i32
    return %arg0, %c0_i32 : i32, i32
  }
  func.func @transform_1(%arg0: i32) -> (i32, i32, i32) {
    %c0_i32 = arith.constant 0 : i32
    %c0_i32_0 = arith.constant 0 : i32
    %c0_i32_1 = arith.constant 0 : i32
    return %arg0, %c0_i32, %c0_i32_0 : i32, i32, i32
  }
  func.func @transform_2(%arg0: i32) -> (i32, i32) {
    %c0_i32 = arith.constant 0 : i32
    %c0_i32_0 = arith.constant 0 : i32
    %c0_i32_1 = arith.constant 0 : i32
    return %c0_i32, %c0_i32_0 : i32, i32
  }
  func.func @transform_3(%arg0: i32) -> (i32, i32) {
    %c0_i32 = arith.constant 0 : i32
    %c0_i32_0 = arith.constant 0 : i32
    %c0_i32_1 = arith.constant 0 : i32
    return %c0_i32, %c0_i32_0 : i32, i32
  }
  func.func @transform_4(%arg0: i32) -> (i32, i32) {
    %c0_i32 = arith.constant 0 : i32
    %c0_i32_0 = arith.constant 0 : i32
    %c0_i32_1 = arith.constant 0 : i32
    return %c0_i32, %c0_i32_0 : i32, i32
  }
  func.func @transform_5(%arg0: i32) -> (i32, i32) {
    %c0_i32 = arith.constant 0 : i32
    %c0_i32_0 = arith.constant 0 : i32
    %c0_i32_1 = arith.constant 0 : i32
    return %c0_i32, %c0_i32_0 : i32, i32
  }
  func.func @transform_6(%arg0: i32) -> (i32, i32) {
    %c0_i32 = arith.constant 0 : i32
    %c0_i32_0 = arith.constant 0 : i32
    %c0_i32_1 = arith.constant 0 : i32
    return %c0_i32, %c0_i32_0 : i32, i32
  }
  func.func @transform_7(%arg0: i32) -> (i32, i32) {
    %c0_i32 = arith.constant 0 : i32
    %c0_i32_0 = arith.constant 0 : i32
    %c0_i32_1 = arith.constant 0 : i32
    return %c0_i32, %c0_i32_0 : i32, i32
  }
  func.func @transform_8(%arg0: i32) -> (i32, i32) {
    %c0_i32 = arith.constant 0 : i32
    %c0_i32_0 = arith.constant 0 : i32
    %c0_i32_1 = arith.constant 0 : i32
    return %c0_i32, %c0_i32_0 : i32, i32
  }
  func.func @transform_9(%arg0: i32) -> (i32, i32) {
    %c0_i32 = arith.constant 0 : i32
    %c0_i32_0 = arith.constant 0 : i32
    %c0_i32_1 = arith.constant 0 : i32
    return %c0_i32, %c0_i32_0 : i32, i32
  }
  func.func @transform_10(%arg0: i32) -> (i32, i32) {
    %c0_i32 = arith.constant 0 : i32
    %c0_i32_0 = arith.constant 0 : i32
    %c0_i32_1 = arith.constant 0 : i32
    return %c0_i32, %c0_i32_0 : i32, i32
  }
  func.func @transform_11(%arg0: i32) -> (i32, i32) {
    %c0_i32 = arith.constant 0 : i32
    %c0_i32_0 = arith.constant 0 : i32
    %c0_i32_1 = arith.constant 0 : i32
    return %c0_i32, %c0_i32_0 : i32, i32
  }
  func.func @transform_12(%arg0: i32) -> (i32, i32) {
    %c0_i32 = arith.constant 0 : i32
    %c0_i32_0 = arith.constant 0 : i32
    return %arg0, %c0_i32 : i32, i32
  }
}

</mosaic_0001>

<bundles_post_ra>
// kernel: tpu_custom_call.1
= control target key start
LH: loop header
LB: loop body
LE: loop exit
PB: predicated region body
PF: predicated region fallthrough
CT: control target
= control target key end

     0   :  { %17 = vsyncpa [#allocation3], 0  ;;  %s1553_s0 = inlined_call_operand.vmem [shape: f32[16,32], index: 0, kind: input, shape index: {}]   ;;  %s1554_s1 = inlined_call_operand.hbm [shape: f32[2,1,8], index: 1, kind: input, shape index: {}]   ;;  %s1555_s2 = inlined_call_operand.vmem [shape: bf16[32,96], index: 2, kind: input, shape index: {}]   ;;  %s1556_s3 = inlined_call_operand.vmem [shape: f32[1,96], index: 3, kind: input, shape index: {}]   ;;  %s1557_s4 = inlined_call_operand.vmem [shape: f32[1,32], index: 4, kind: input, shape index: {}]   ;;  %s1558_s5 = inlined_call_operand.vmem [shape: f32[1,32], index: 5, kind: input, shape index: {}]   ;;  %s1559_s6 = inlined_call_operand.vmem [shape: bf16[32,64], index: 6, kind: input, shape index: {}]   ;;  %s1560_s7 = inlined_call_operand.vmem [shape: f32[1,64], index: 7, kind: input, shape index: {}]   ;;  %s1561_s8 = inlined_call_operand.vmem [shape: bf16[64,32], index: 8, kind: input, shape index: {}]   ;;  %s1562_s9 = inlined_call_operand.vmem [shape: f32[1,32], index: 9, kind: input, shape index: {}]   ;;  %s1563_s10 = inlined_call_operand.vmem [shape: f32[1,32], index: 10, kind: input, shape index: {}]   ;;  %s1564_s11 = inlined_call_operand.vmem [shape: f32[1,32], index: 11, kind: input, shape index: {}]   ;;  %s1565_s12 = inlined_call_operand.hbm [shape: f32[16,32], index: 12, kind: output, shape index: {}]  }
   0x1   :  { %19 = vsyncpa [#allocation3 + $0x1], 0 }
   0x2   :  { %20 = vsyncpa [#allocation4], 0 }
   0x3   :  { %22 = vsyncpa [#allocation4 + $0x1], 0  ;;  %s1323_s21 = smov 0   ;;  %s1325_s22 = smov 0  }
   0x4   :  { %s1327_s23 = smov 0   ;;  %s1329_s24 = smov 0  }
   0x5 LB: > { %1570 = sst [smem:[#allocation8_spill]] %s1237_s23  ;;  %s1344_s25 = sadd.s32 4294967295, %s1241_s24   ;;  %s1241_s24 = sphi %s1329_s24, %s1581_s24   ;;  %s1237_s23 = sphi %s1327_s23, %s1583_s23   ;;  %s1233_s22 = sphi %s1325_s22, %s1585_s22   ;;  %s1229_s21 = sphi %s1323_s21, %s1584_s21  }
   0x6   : > { %s993_s26 = sadd.s32 4294967294, %s1241_s24   ;;  %s1348_s27 = sadd.s32 1, %s1241_s24  }
   0x7   : > { %1571 = sst [smem:[#allocation9_spill]] %s1348_s27  ;;  %s61_s28 = sadd.s32 1, %s1237_s23 }
   0x8   : > { %s58_s29 = ssub.s32 %s1241_s24, %s1348_s27  ;;  %p68_p0 = scmp.ne.s32.totalorder %s1237_s23, %s1233_s22 }
   0x9   : > { %p59_p1 = scmp.eq.s32.totalorder %s58_s29, 0  ;;  %p69_p2 = scmp.eq.s32.totalorder %s1241_s24, 0 }
   0xa   : > { %p74_p3 = scmp.ne.s32.totalorder %s1233_s22, %s1229_s21  ;;  %p75_p4 = scmp.eq.s32.totalorder %s1344_s25, 0 }
   0xb   : > { %s1360_s30 = scalar_select %p59_p1, %s1237_s23, %s61_s28  }
   0xc   : > { %p1362_p5 = por %p69_p2, %p68_p0  ;;  %p1366_p6 = por %p75_p4, %p74_p3 }
   0xd   : > { %1572 = sst [smem:[#allocation10_spill]] %s1360_s30  ;;  %p308_p7 = scmp.eq.s32.totalorder %s1344_s25, 1 }
   0xe   : > { %p314_p8 = scmp.eq.s32.totalorder %s993_s26, 1  ;;  %p1066_p10 = scmp.lt.s32.totalorder %s1241_s24, 2 }
   0xf   : > { %p1373_p11 = por %p308_p7, %p68_p0  ;;  %s371_s17 = sand.u32 1, %s1237_s23  }
  0x10   : > { %p1377_p12 = por %p314_p8, %p74_p3  ;;  %s377_s20 = scalar_lea.hbm %s1554_s1, %s1241_s24 }
  0x11   : > { %s379_s28 = sshll.u32 %s377_s20, 4  ;;  %s374_s29 = scalar_lea.vmem [#allocation2], %s371_s17  ;;  %s380_s28 = int_to_ptr.hbm [resolvable:$true] %s379_s28 }
  0x12   : > { %s1576_s16 = scalar_select %p1377_p12, 1, 0 }
  0x13   : > { %s381_s30 = sshll.u32 %s374_s29, 4  ;;  %p1388_p13 = pnand %p1066_p10, %p1362_p5  ;;  %s382_s30 = int_to_ptr.vmem [resolvable:$true] %s381_s30 }
  0x14   : > { %1577 = sst [smem:[#allocation11_spill]] %s1576_s16  ;;  %p996_p0 = scmp.ge.s32.totalorder %s1241_s24, 1 }
  0x15   : > { %p386_p1 = scmp.lt.s32.totalorder %s1241_s24, 3  ;;  %s372_s27 = scalar_lea.sflag [#allocation3], %s371_s17 }
  0x16   : > { %s1145_s16 = sshra.s32 %s380_s28, 4  ;;  %p1149_p3 = pneg %p1388_p13  ;;  %s1146_s16 = int_to_ptr.hbm [resolvable:$true] %s1145_s16 }
  0x17   : > { %s1147_s23 = scalar_lea.hbm %s1146_s16, 1  ;;  %s1152_s13 = scalar_lea.hbm %s1554_s1, 2 }
  0x18   : > { %p1148_p2 = scmp.ne.s32.totalorder %s1146_s16, %s1147_s23  ;;  %p1153_p5 = scmp.lt.s32.totalorder %s1146_s16, %s1554_s1 }
  0x19   : > { %p1154_p8 = scmp.lt.s32.totalorder %s1152_s13, %s1147_s23 }
  0x1a   : > { %p1150_p4 = pnand %p1149_p3, %p1148_p2 }
  0x1b   : > { %p1155_p10 = por %p1154_p8, %p1153_p5 }
  0x1c   : > { %p1151_p7 = pneg %p1150_p4 }
  0x1e   : > { %p1156_p9 = pnand %p1155_p10, %p1151_p7 }
  0x20   : > { %1159 = shalt.err (!%p1156_p9)
}
  0x21   : > { %1061 = dma.hbm_to_vmem [thread:$0]  (!%p1388_p13), %s380_s28, 16, %s382_s30, %s372_s27  }
  0x22   : > { %p387_p2 = pnand %p996_p0, %p386_p1 }
  0x23   : > { %s1409_s17 = sand.u32 (!%p387_p2), 1, %s1233_s22  }
  0x24   : > { %390 = sbr.rel (%p387_p2) target bundleno = 1792 (0x700), region = 68  ;;  %s393_s16 = scalar_lea.sflag (!%p387_p2), [#allocation3], %s1409_s17 }
  0x25   : > { %s395_s23 = scalar_lea.vmem (!%p387_p2), [#allocation2], %s1409_s17 }
  0x29   : > { %1220 = dma.done.wait (%p1366_p6), %s393_s16, 16  }
  0x2a   : > { %1222 = vsyncadd (%p1366_p6), %s393_s16, 4294967280  ;;  %p440_p9 = scmp.lt.s32.totalorder %s1344_s25, 1  ;;  %v1047_v0 = vld [vmem:[%s1555_s2 + $0x8] sm:$0xff]  ;;  %v1046_v1 = vld [vmem:[%s1555_s2] sm:$0xff]  ;;  %vm467_vm0 = vcmask 261120   ;;  %s1245_s28 = smov 96  }
  0x2b   : > { %477 = vmatpush.bf16.msra.mxu0 %v1047_v0  ;;  %v1115_v4 = vld [vmem:[%s1556_s3] ss:$0 sm:$0xff]  ;;  %s1246_s26 = smov 80   ;;  %s1248_s19 = smov 88   ;;  %vm494_vm1 = vcmask 64512   ;;  %vm531_vm2 = vcmask 1043456  }
  0x2c   : > { %s441_s27 = scalar_select %p440_p9, %s1344_s25, 1  ;;  %v1116_v22 = vld [vmem:[%s395_s23] ss:$0 sm:$0xff]  ;;  %vm729_vm3 = vcmask 130048   ;;  %vm731_vm4 = vcmask 195584   ;;  %vm848_vm9 = vcmask 523264  }
  0x2d   : > { %s1249_s13 = smov 112   ;;  %s1250_s23 = smov 64  }
  0x2e   : > { %s998_s30 = sshll.u32 %s441_s27, 3  ;;  %s1243_s27 = smov 104  }
  0x2f   : > { %s443_s18 = scalar_lea.vmem %s1553_s0, %s998_s30  ;;  %478 = vmatpush.bf16.msra.mxu0 %v1046_v1  ;;  %s1244_s30 = smov 120  }
  0x30   : > { %v1428_v2 = vld [vmem:[%s443_s18] sm:$0xff]  ;;  %s1247_s18 = smov 72   ;;  %s1251_s20 = smov 40  }
  0x31   : > { %v446_v3 = vpack.c.bf16 %v1428_v2, %v1428_v2  ;;  %s1252_s29 = smov 56   ;;  %s1253_s14 = smov 48  }
  0x32   : > { %s1254_s16 = smov 8  }
  0x33   : > { %1007 = vmatmul.msk.bf16.vlgmr.msra.gmra.mxu0 %vm467_vm0, %v446_v3 }
  0xb0   : > { %v480_v5 = vpop.f32.mrf.mxu0 }
  0xb1   : > { %v481_v6 = vadd.f32 %v1115_v4, %v480_v5 }
  0xb3   : > { %v484_v7 = vpack.c.bf16 %v481_v6, %v481_v6 }
  0xb5   : > { %v490_v8 = vunpack.c.l.b16 %v484_v7 }
  0xb7   : > { %v1436_v9 = vpack.c.b16 %v490_v8, %v490_v8 }
  0xb8   : > { %v482_v10 = vpop.f32.mrf.mxu0 }
  0xb9   : > { %660 = vrot.lane.b32.xlu2 %v1436_v9, %s1243_s27  ;;  %548 = vrot.lane.b32.xlu1 %v1436_v9, %s1244_s30  ;;  %s1255_s27 = smov 16   ;;  %s1256_s30 = smov 24  }
  0xba   : > { %492 = vrot.lane.b32.xlu0 %v1436_v9, %s1245_s28 }
  0xc1   : > { %606 = vrot.lane.b32.xlu2 %v1436_v9, %s1246_s26  ;;  %662 = vrot.lane.b32.xlu1 %v1436_v9, %s1247_s18 }
  0xc2   : > { %550 = vrot.lane.b32.xlu0 %v1436_v9, %s1248_s19 }
  0xca   : > { %604 = vrot.lane.b32.xlu0 %v1436_v9, %s1249_s13 }
 0x113   : > { %v661_v11 = vpop.permute.xlu2 %660 }
 0x11b   : > { %v607_v12 = vpop.permute.xlu2 %606 }
 0x11c   : > { %v612_v13 = vsel %vm494_vm1, %v607_v12, 0 }
 0x11d   : > { %621 = vmatpush.bf16.xpose.msrb.mxu0 %v612_v13 }
 0x12b   : > { %v549_v14 = vpop.permute.xlu1 %548 }
 0x12c   : > { %v493_v15 = vpop.permute.xlu0 %492 }
 0x12d   : > { %v499_v16 = vsel %vm494_vm1, %v493_v15, 0 }
 0x12e   : > { %508 = vmatpush.bf16.xpose.msra.mxu1 %v499_v16 }
 0x133   : > { %v663_v17 = vpop.permute.xlu1 %662 }
 0x134   : > { %v551_v18 = vpop.permute.xlu0 %550  ;;  %v668_v19 = vsel %vm494_vm1, %v663_v17, 0 }
 0x135   : > { %1008 = vmatmul.msk.bf16.vlgmr.msra.gmra.mxu1 %vm494_vm1, %v484_v7  ;;  %v556_v20 = vsel %vm494_vm1, %v551_v18, 0 }
 0x136   : > { %565 = vmatpush.bf16.xpose.msra.mxu3 %v556_v20 }
 0x13c   : > { %v605_v21 = vpop.permute.xlu0 %604 }
 0x13d   : > { %1010 = vmatmul.msk.bf16.vlgmr.msra.gmra.mxu3 %vm494_vm1, %v549_v14  ;;  %1012 = vmatmul.msk.bf16.vlgmr.msrb.gmra.mxu0 %vm494_vm1, %v605_v21 }
 0x13e   : > { %677 = vmatpush.bf16.xpose.msrb.mxu3 %v668_v19 }
 0x14d   : > { %1014 = vmatmul.msk.bf16.vlgmr.msrb.gmra.mxu3 %vm494_vm1, %v661_v11 }
 0x1b2   : > { %v510_v23 = vpop.f32.mrf.mxu1 }
 0x1b3   : > { %v511_v24 = vadd.f32 %v1116_v22, %v510_v23 }
 0x1b5   : > { %v514_v25 = vsel %vm494_vm1, %v511_v24, -inf }
 0x1b6   : > { %515 = vmax.xlane.f32.xlu1 %v514_v25 }
 0x1ba   : > { %v512_v26 = vpop.f32.mrf.mxu1  ;;  %v623_v27 = vpop.f32.mrf.mxu0 }
 0x1bb   : > { %v624_v32 = vadd.f32 %v1116_v22, %v623_v27 }
 0x1bd   : > { %v627_v34 = vsel %vm494_vm1, %v624_v32, -inf }
 0x1c0   : > { %v567_v28 = vpop.f32.mrf.mxu3 }
 0x1c1   : > { %v568_v29 = vadd.f32 %v1116_v22, %v567_v28 }
 0x1c2   : > { %v625_v30 = vpop.f32.mrf.mxu0 }
 0x1c3   : > { %v571_v31 = vsel %vm494_vm1, %v568_v29, -inf }
 0x1c4   : > { %572 = vmax.xlane.f32.xlu2 %v571_v31 }
 0x1c8   : > { %v569_v33 = vpop.f32.mrf.mxu3 }
 0x1cc   : > { %628 = vmax.xlane.f32.xlu2 %v627_v34 }
 0x1d0   : > { %v679_v35 = vpop.f32.mrf.mxu3 }
 0x1d1   : > { %v680_v36 = vadd.f32 %v1116_v22, %v679_v35 }
 0x1d3   : > { %v683_v37 = vsel %vm494_vm1, %v680_v36, -inf }
 0x1d4   : > { %684 = vmax.xlane.f32.xlu0 %v683_v37 }
 0x1d8   : > { %v681_v38 = vpop.f32.mrf.mxu3 }
 0x1e4   : > { %526 = vrot.lane.b32.xlu2 %v1436_v9, %s1250_s23 }
 0x1ec   : > { %695 = vrot.lane.b32.xlu2 %v1436_v9, %s1251_s20 }
 0x229   : > { %v516_v39 = vpop.xlane.xlu1 %515 }
 0x22a   : > { %v517_v40 = vsub.f32 %v511_v24, %v516_v39 }
 0x22c   : > { %v518_v41 = vmul.f32 1.442695, %v517_v40 }
 0x22e   : > { %1123 = vpow2.f32 %v518_v41 }
 0x234   : > { %v1124_v42 = vpop.eup %1123 }
 0x235   : > { %v520_v43 = vsel %vm494_vm1, %v1124_v42, 0.0 }
 0x236   : > { %521 = vadd.xlane.f32.xlu1 %v520_v43 }
 0x237   : > { %v573_v44 = vpop.xlane.xlu2 %572 }
 0x238   : > { %v574_v47 = vsub.f32 %v568_v29, %v573_v44 }
 0x23a   : > { %v575_v49 = vmul.f32 1.442695, %v574_v47 }
 0x23f   : > { %v629_v45 = vpop.xlane.xlu2 %628 }
 0x240   : > { %v630_v46 = vsub.f32 %v624_v32, %v629_v45 }
 0x242   : > { %v631_v48 = vmul.f32 1.442695, %v630_v46 }
 0x244   : > { %1125 = vpow2.f32 %v631_v48  ;;  %v1048_v48 = vld [vmem:[%s1559_s6] sm:$0xff] }
 0x245   : > { %1127 = vpow2.f32 %v575_v49  ;;  %v1053_v49 = vld [vmem:[%s1561_s8 + $0x18] sm:$0xff] }
 0x247   : > { %v527_v50 = vpop.permute.xlu2 %526  ;;  %v685_v51 = vpop.xlane.xlu0 %684 }
 0x248   : > { %v533_v52 = vsel %vm531_vm2, %v527_v50, 0  ;;  %v686_v54 = vsub.f32 %v680_v36, %v685_v51  ;;  %v1257_v36 = vmov 32.0  }
 0x249   : > { %542 = vmatpush.bf16.msra.mxu2 %v533_v52  ;;  %v1052_v52 = vld [vmem:[%s1561_s8 + $0x10] sm:$0xff] }
 0x24a   : > { %v1126_v53 = vpop.eup %1125  ;;  %v687_v56 = vmul.f32 1.442695, %v686_v54  ;;  %v1051_v54 = vld [vmem:[%s1561_s8 + $0x8] sm:$0xff] }
 0x24b   : > { %v633_v55 = vsel %vm494_vm1, %v1126_v53, 0.0  ;;  %v1128_v57 = vpop.eup %1127 }
 0x24c   : > { %634 = vadd.xlane.f32.xlu0 %v633_v55  ;;  %1129 = vpow2.f32 %v687_v56  ;;  %v577_v58 = vsel %vm494_vm1, %v1128_v57, 0.0 }
 0x24f   : > { %583 = vrot.lane.b32.xlu1 %v1436_v9, %s1252_s29  ;;  %v696_v3 = vpop.permute.xlu2 %695  ;;  %s900_s29 = scalar_lea.sflag [#allocation4], %s1409_s17 }
 0x250   : > { %v701_v6 = vsel %vm531_vm2, %v696_v3, 0 }
 0x252   : > { %v1130_v59 = vpop.eup %1129 }
 0x253   : > { %v689_v60 = vsel %vm494_vm1, %v1130_v59, 0.0 }
 0x254   : > { %578 = vadd.xlane.f32.xlu0 %v577_v58 }
 0x25c   : > { %690 = vadd.xlane.f32.xlu0 %v689_v60 }
 0x270   : > { %639 = vrot.lane.b32.xlu0 %v1436_v9, %s1253_s14  ;;  %s997_s14 = sshll.u32 %s1409_s17, 3 }
 0x2a9   : > { %v522_v61 = vpop.xlane.xlu1 %521 }
 0x2aa   : > { %1131 = vrcp.f32 %v522_v61  ;;  %v1117_v61 = vld [vmem:[%s1557_s4] ss:$0 sm:$0xff] }
 0x2b0   : > { %v1132_v62 = vpop.eup %1131 }
 0x2b1   : > { %v524_v63 = vmul.f32 %v1132_v62, %v1124_v42 }
 0x2b3   : > { %v525_v0 = vpack.c.bf16 %v524_v63, %v524_v63  ;;  %v1118_v63 = vld [vmem:[%s1558_s5] ss:$0 sm:$0xff] }
 0x2b5   : > { %1009 = vmatmul.msk.bf16.vlgmr.msra.gmra.mxu2 %vm494_vm1, %v525_v0 }
 0x2bf   : > { %v635_v1 = vpop.xlane.xlu0 %634 }
 0x2c1   : > { %v584_v4 = vpop.permute.xlu1 %583 }
 0x2c2   : > { %v589_v5 = vsel %vm531_vm2, %v584_v4, 0 }
 0x2c3   : > { %598 = vmatpush.bf16.msrb.mxu2 %v589_v5  ;;  %v1050_v5 = vld [vmem:[%s1561_s8] sm:$0xff] }
 0x2c7   : > { %710 = vmatpush.bf16.msra.mxu2 %v701_v6  ;;  %v579_v7 = vpop.xlane.xlu0 %578  ;;  %v1119_v6 = vld [vmem:[%s1560_s7] ss:$0 sm:$0xff] }
 0x2c8   : > { %1133 = vrcp.f32 %v579_v7 }
 0x2ce   : > { %v1134_v8 = vpop.eup %1133 }
 0x2cf   : > { %v581_v9 = vmul.f32 %v1134_v8, %v1128_v57  ;;  %v691_v10 = vpop.xlane.xlu0 %690 }
 0x2d0   : > { %1135 = vrcp.f32 %v691_v10 }
 0x2d1   : > { %v582_v11 = vpack.c.bf16 %v581_v9, %v581_v9  ;;  %1137 = vrcp.f32 %v635_v1 }
 0x2d2   : > { %1139 = vrcp.f32 %v1257_v36 }
 0x2d3   : > { %1011 = vmatmul.msk.bf16.vlgmr.msrb.gmra.mxu2 %vm494_vm1, %v582_v11 }
 0x2d6   : > { %v1136_v12 = vpop.eup %1135 }
 0x2d7   : > { %v693_v13 = vmul.f32 %v1136_v12, %v1130_v59  ;;  %v1138_v14 = vpop.eup %1137  ;;  %v1120_v12 = vld [vmem:[%s1562_s9] ss:$0 sm:$0xff] }
 0x2d8   : > { %v637_v15 = vmul.f32 %v1138_v14, %v1126_v53  ;;  %v1140_v37 = vpop.eup %1139 }
 0x2d9   : > { %v694_v16 = vpack.c.bf16 %v693_v13, %v693_v13  ;;  %v740_v38 = vmul.f32 32.0, %v1140_v37  ;;  %vm744_vm5 = vweird.f32 %v1140_v37 }
 0x2da   : > { %v638_v19 = vpack.c.bf16 %v637_v15, %v637_v15 }
 0x2db   : > { %v741_v39 = vsub.f32 1.0, %v740_v38 }
 0x2dd   : > { %v742_v40 = vmul.f32 %v1140_v37, %v741_v39 }
 0x2df   : > { %v743_v41 = vadd.f32 %v1140_v37, %v742_v40 }
 0x2e1   : > { %v745_v42 = vsel %vm744_vm5, %v1140_v37, %v743_v41 }
 0x2e2   : > { %v640_v17 = vpop.permute.xlu0 %639 }
 0x2e3   : > { %1015 = vmatmul.msk.bf16.vlgmr.msra.gmra.mxu2 %vm494_vm1, %v694_v16  ;;  %v645_v18 = vsel %vm531_vm2, %v640_v17, 0 }
 0x2e4   : > { %654 = vmatpush.bf16.msrb.mxu1 %v645_v18 }
 0x2e7   : > { %1013 = vmatmul.msk.bf16.vlgmr.msrb.gmra.mxu1 %vm494_vm1, %v638_v19 }
 0x2e8   : > { %856 = vmatpush.bf16.msra.mxu1 %v1053_v49 }
 0x2ec   : > { %857 = vmatpush.bf16.msra.mxu1 %v1052_v52 }
 0x2f0   : > { %858 = vmatpush.bf16.msra.mxu1 %v1051_v54 }
 0x2f4   : > { %859 = vmatpush.bf16.msra.mxu1 %v1050_v5 }
 0x338   : > { %v544_v20 = vpop.f32.mrf.mxu2 }
 0x340   : > { %v546_v21 = vpop.f32.mrf.mxu2 }
 0x356   : > { %v600_v22 = vpop.f32.mrf.mxu2 }
 0x357   : > { %717 = vrot.lane.b32.xlu1 %v600_v22, %s1254_s16  ;;  %s1043_s16 = sshll.u32 %s1344_s25, 3  ;;  %s439_s25 = scalar_lea.vmem [#allocation5], %s997_s14 }
 0x358   : > { %s910_s18 = scalar_lea.hbm %s1565_s12, %s1043_s16  ;;  %s912_s23 = sshll.u32 %s439_s25, 4  ;;  %s913_s23 = int_to_ptr.vmem [resolvable:$true] %s912_s23 }
 0x359   : > { %s914_s20 = sshll.u32 %s910_s18, 4  ;;  %s1195_s14 = scalar_lea.hbm %s1565_s12, 16  ;;  %s915_s20 = int_to_ptr.hbm [resolvable:$true] %s914_s20 }
 0x35e   : > { %v602_v23 = vpop.f32.mrf.mxu2 }
 0x364   : > { %v656_v24 = vpop.f32.mrf.mxu1 }
 0x365   : > { %721 = vrot.lane.b32.xlu2 %v656_v24, %s1255_s27  ;;  %s1189_s27 = sshra.s32 %s915_s20, 4  ;;  %s1190_s27 = int_to_ptr.hbm [resolvable:$true] %s1189_s27 }
 0x366   : > { %v712_v25 = vpop.f32.mrf.mxu2  ;;  %s1191_s16 = scalar_lea.hbm %s1190_s27, 8  ;;  %p1196_p1 = scmp.lt.s32.totalorder %s1190_s27, %s1565_s12 }
 0x367   : > { %725 = vrot.lane.b32.xlu1 %v712_v25, %s1256_s30  ;;  %p1192_p6 = scmp.ne.s32.totalorder %s1190_s27, %s1191_s16  ;;  %p1197_p3 = scmp.lt.s32.totalorder %s1195_s14, %s1191_s16 }
 0x369   : > { %p1193_p13 = pnand %p1192_p6, %p1373_p11  ;;  %p1198_p4 = por %p1197_p3, %p1196_p1 }
 0x36b   : > { %p1194_p0 = pneg %p1193_p13 }
 0x36c   : > { %v658_v26 = vpop.f32.mrf.mxu1 }
 0x36d   : > { %p1199_p7 = pnand %p1198_p4, %p1194_p0 }
 0x36e   : > { %v714_v27 = vpop.f32.mrf.mxu2 }
 0x3bf   : > { %v722_v30 = vpop.permute.xlu2 %721 }
 0x3c9   : > { %v718_v28 = vpop.permute.xlu1 %717 }
 0x3ca   : > { %v728_v29 = vsel %vm494_vm1, %v544_v20, %v718_v28 }
 0x3cb   : > { %v730_v32 = vsel %vm729_vm3, %v728_v29, %v722_v30 }
 0x3d9   : > { %v726_v31 = vpop.permute.xlu1 %725 }
 0x3da   : > { %v732_v33 = vsel %vm731_vm4, %v730_v32, %v726_v31  ;;  %v1121_v32 = vld [vmem:[%s1563_s10] ss:$0 sm:$0xff] }
 0x3db   : > { %v733_v34 = vadd.f32 %v732_v33, %v1428_v2  ;;  %v1049_v2 = vld [vmem:[%s1559_s6 + $0x8] sm:$0xff] }
 0x3dc   : > { %803 = vmatpush.bf16.msra.mxu0 %v1049_v2 }
 0x3dd   : > { %v736_v35 = vsel %vm467_vm0, %v733_v34, 0.0 }
 0x3de   : > { %737 = vadd.xlane.f32.xlu2 %v736_v35  ;;  %v1122_v35 = vld [vmem:[%s1564_s11] ss:$0 sm:$0xff] }
 0x3e0   : > { %804 = vmatpush.bf16.msra.mxu0 %v1048_v48 }
 0x451   : > { %v738_v43 = vpop.xlane.xlu2 %737 }
 0x452   : > { %v746_v44 = vmul.f32 %v745_v42, %v738_v43 }
 0x454   : > { %v747_v45 = vsub.f32 %v733_v34, %v746_v44 }
 0x456   : > { %v748_v46 = vmul.f32 %v747_v45, %v747_v45 }
 0x458   : > { %v749_v47 = vsel %vm467_vm0, %v748_v46, 0.0 }
 0x459   : > { %750 = vadd.xlane.f32.xlu1 %v749_v47 }
 0x4cc   : > { %v751_v50 = vpop.xlane.xlu1 %750 }
 0x4cd   : > { %v752_v51 = vmul.f32 %v751_v50, %v745_v42 }
 0x4cf   : > { %v753_v53 = vadd.f32 1e-05, %v752_v51 }
 0x4d1   : > { %1141 = vrsqrt.f32 %v753_v53  ;;  %vm760_vm7 = vweird.f32 %v753_v53 }
 0x4d7   : > { %v1142_v55 = vpop.eup %1141 }
 0x4d8   : > { %v755_v56 = vmul.f32 %v1142_v55, %v753_v53  ;;  %vm761_vm6 = vweird.f32 %v1142_v55 }
 0x4d9   : > { %vm762_vm8 = vmor %vm760_vm7, %vm761_vm6 }
 0x4da   : > { %v756_v57 = vmul.f32 %v1142_v55, %v755_v56 }
 0x4dc   : > { %v757_v58 = vmul.f32 0.5, %v756_v57 }
 0x4de   : > { %v758_v59 = vsub.f32 1.5, %v757_v58 }
 0x4e0   : > { %v759_v60 = vmul.f32 %v1142_v55, %v758_v59 }
 0x4e2   : > { %v763_v62 = vsel %vm762_vm8, %v1142_v55, %v759_v60 }
 0x4e3   : > { %v764_v0 = vmul.f32 %v763_v62, %v747_v45 }
 0x4e5   : > { %v768_v1 = vmul.f32 %v1117_v61, %v764_v0 }
 0x4e7   : > { %v772_v3 = vadd.f32 %v1118_v63, %v768_v1 }
 0x4e9   : > { %v773_v4 = vpack.c.bf16 %v772_v3, %v772_v3 }
 0x4eb   : > { %1024 = vmatmul.msk.bf16.vlgmr.msra.gmra.mxu0 %vm467_vm0, %v773_v4 }
 0x568   : > { %v806_v7 = vpop.f32.mrf.mxu0 }
 0x569   : > { %v807_v8 = vadd.f32 %v1119_v6, %v806_v7 }
 0x56b   : > { %v810_v9 = vmax.f32 %v807_v8, 0.0 }
 0x56d   : > { %v811_v10 = vpack.c.bf16 %v810_v9, %v810_v9 }
 0x56f   : > { %1041 = vmatmul.msk.bf16.vlgmr.msra.gmra.mxu1 %vm848_vm9, %v811_v10 }
 0x570   : > { %v808_v11 = vpop.f32.mrf.mxu0 }
 0x5ec   : > { %v861_v13 = vpop.f32.mrf.mxu1 }
 0x5ed   : > { %v862_v14 = vadd.f32 %v1120_v12, %v861_v13 }
 0x5ef   : > { %v865_v15 = vadd.f32 %v862_v14, %v772_v3 }
 0x5f1   : > { %v868_v16 = vsel %vm467_vm0, %v865_v15, 0.0 }
 0x5f2   : > { %869 = vadd.xlane.f32.xlu0 %v868_v16 }
 0x5f4   : > { %v863_v17 = vpop.f32.mrf.mxu1 }
 0x665   : > { %v870_v18 = vpop.xlane.xlu0 %869 }
 0x666   : > { %v871_v19 = vmul.f32 %v870_v18, %v745_v42 }
 0x668   : > { %v872_v20 = vsub.f32 %v865_v15, %v871_v19 }
 0x66a   : > { %v873_v21 = vmul.f32 %v872_v20, %v872_v20 }
 0x66c   : > { %v874_v22 = vsel %vm467_vm0, %v873_v21, 0.0 }
 0x66d   : > { %875 = vadd.xlane.f32.xlu2 %v874_v22 }
 0x6e0   : > { %v876_v23 = vpop.xlane.xlu2 %875 }
 0x6e1   : > { %v877_v24 = vmul.f32 %v876_v23, %v745_v42 }
 0x6e3   : > { %v878_v25 = vadd.f32 1e-05, %v877_v24 }
 0x6e5   : > { %1143 = vrsqrt.f32 %v878_v25  ;;  %vm885_vm11 = vweird.f32 %v878_v25 }
 0x6eb   : > { %v1144_v26 = vpop.eup %1143 }
 0x6ec   : > { %v880_v27 = vmul.f32 %v1144_v26, %v878_v25  ;;  %vm886_vm10 = vweird.f32 %v1144_v26 }
 0x6ed   : > { %vm887_vm12 = vmor %vm885_vm11, %vm886_vm10 }
 0x6ee   : > { %v881_v28 = vmul.f32 %v1144_v26, %v880_v27 }
 0x6f0   : > { %v882_v29 = vmul.f32 0.5, %v881_v28 }
 0x6f2   : > { %v883_v30 = vsub.f32 1.5, %v882_v29 }
 0x6f4   : > { %v884_v31 = vmul.f32 %v1144_v26, %v883_v30 }
 0x6f6   : > { %v888_v33 = vsel %vm887_vm12, %v1144_v26, %v884_v31 }
 0x6f7   : > { %v889_v34 = vmul.f32 %v888_v33, %v872_v20 }
 0x6f9   : > { %v893_v36 = vmul.f32 %v1121_v32, %v889_v34 }
 0x6fb   : > { %v897_v37 = vadd.f32 %v1122_v35, %v893_v36 }
 0x6fd   : > { %898 = vst.msk [vmem:[%s439_s25] sm:$0xff] %vm467_vm0, %v897_v37 }
 0x6fe   : > { %1202 = shalt.err (!%p1199_p7)
}
 0x6ff   : > { %1056 = dma.vmem_to_hbm [thread:$0]  (%p1373_p11), %s913_s23, 128, %s915_s20, %s900_s29  }
 0x700 PF: > { %s926_s19 = sand.u32 1, %s1229_s21   ;;  %p1580_p5 = scmp.ge.s32.totalorder %s1241_s24, 2 }
 0x701   : > { %s927_s13 = scalar_lea.sflag [#allocation4], %s926_s19 }
 0x702   : > { %p1063_p8 = pnand %p1580_p5, %p1377_p12 }
 0x704   : > { %p1064_p10 = pneg %p1063_p8 }
 0x706   : > { %1224 = dma.done.wait (%p1064_p10), %s927_s13, 128  }
 0x707   : > { %1226 = vsyncadd (%p1064_p10), %s927_s13, 4294967168  ;;  %s1581_s24 = sld [smem:[#allocation9_spill]]  ;;  %s1584_s21 = smov %s1233_s22 }
 0x708   : > { %s1582_s25 = sld [smem:[#allocation8_spill]] }
 0x709   : > { %s1583_s23 = sld [smem:[#allocation10_spill]] }
 0x70d   : > { %p25_p2 = scmp.ge.s32.totalorder %s1581_s24, 4  }
 0x70e   : > { %s1585_s22 = smov %s1582_s25 }
 0x70f   :  { %27 = sbr.rel (!%p25_p2) target bundleno = 5 (0x5), region = 116 }
 0x714   :  { %933 = vsyncpa [#allocation3], 1 }
 0x715   :  { %935 = vsyncpa [#allocation3 + $0x1], 1 }
 0x716   :  { %936 = vsyncpa [#allocation4], 1 }
 0x717   :  { %938 = vsyncpa [#allocation4 + $0x1], 1 }

// kernel: tpu_custom_call.1
= control target key start
LH: loop header
LB: loop body
LE: loop exit
PB: predicated region body
PF: predicated region fallthrough
CT: control target
= control target key end

     0   :  { %17 = vsyncpa [#allocation3], 0  ;;  %s1553_s0 = inlined_call_operand.vmem [shape: f32[16,32], index: 0, kind: input, shape index: {}]   ;;  %s1554_s1 = inlined_call_operand.hbm [shape: f32[2,1,8], index: 1, kind: input, shape index: {}]   ;;  %s1555_s2 = inlined_call_operand.vmem [shape: bf16[32,96], index: 2, kind: input, shape index: {}]   ;;  %s1556_s3 = inlined_call_operand.vmem [shape: f32[1,96], index: 3, kind: input, shape index: {}]   ;;  %s1557_s4 = inlined_call_operand.vmem [shape: f32[1,32], index: 4, kind: input, shape index: {}]   ;;  %s1558_s5 = inlined_call_operand.vmem [shape: f32[1,32], index: 5, kind: input, shape index: {}]   ;;  %s1559_s6 = inlined_call_operand.vmem [shape: bf16[32,64], index: 6, kind: input, shape index: {}]   ;;  %s1560_s7 = inlined_call_operand.vmem [shape: f32[1,64], index: 7, kind: input, shape index: {}]   ;;  %s1561_s8 = inlined_call_operand.vmem [shape: bf16[64,32], index: 8, kind: input, shape index: {}]   ;;  %s1562_s9 = inlined_call_operand.vmem [shape: f32[1,32], index: 9, kind: input, shape index: {}]   ;;  %s1563_s10 = inlined_call_operand.vmem [shape: f32[1,32], index: 10, kind: input, shape index: {}]   ;;  %s1564_s11 = inlined_call_operand.vmem [shape: f32[1,32], index: 11, kind: input, shape index: {}]   ;;  %s1565_s12 = inlined_call_operand.hbm [shape: f32[16,32], index: 12, kind: output, shape index: {}]  }
   0x1   :  { %19 = vsyncpa [#allocation3 + $0x1], 0 }
   0x2   :  { %20 = vsyncpa [#allocation4], 0 }
   0x3   :  { %22 = vsyncpa [#allocation4 + $0x1], 0  ;;  %s1323_s21 = smov 0   ;;  %s1325_s22 = smov 0  }
   0x4   :  { %s1327_s23 = smov 0   ;;  %s1329_s24 = smov 0  }
   0x5 LB: > { %1570 = sst [smem:[#allocation8_spill]] %s1237_s23  ;;  %s1344_s25 = sadd.s32 4294967295, %s1241_s24   ;;  %s1241_s24 = sphi %s1329_s24, %s1581_s24   ;;  %s1237_s23 = sphi %s1327_s23, %s1583_s23   ;;  %s1233_s22 = sphi %s1325_s22, %s1585_s22   ;;  %s1229_s21 = sphi %s1323_s21, %s1584_s21  }
   0x6   : > { %s993_s26 = sadd.s32 4294967294, %s1241_s24   ;;  %s1348_s27 = sadd.s32 1, %s1241_s24  }
   0x7   : > { %1571 = sst [smem:[#allocation9_spill]] %s1348_s27  ;;  %s61_s28 = sadd.s32 1, %s1237_s23 }
   0x8   : > { %s58_s29 = ssub.s32 %s1241_s24, %s1348_s27  ;;  %p68_p0 = scmp.ne.s32.totalorder %s1237_s23, %s1233_s22 }
   0x9   : > { %p59_p1 = scmp.eq.s32.totalorder %s58_s29, 0  ;;  %p69_p2 = scmp.eq.s32.totalorder %s1241_s24, 0 }
   0xa   : > { %p74_p3 = scmp.ne.s32.totalorder %s1233_s22, %s1229_s21  ;;  %p75_p4 = scmp.eq.s32.totalorder %s1344_s25, 0 }
   0xb   : > { %s1360_s30 = scalar_select %p59_p1, %s1237_s23, %s61_s28  }
   0xc   : > { %p1362_p5 = por %p69_p2, %p68_p0  ;;  %p1366_p6 = por %p75_p4, %p74_p3 }
   0xd   : > { %1572 = sst [smem:[#allocation10_spill]] %s1360_s30  ;;  %p308_p7 = scmp.eq.s32.totalorder %s1344_s25, 1 }
   0xe   : > { %p314_p8 = scmp.eq.s32.totalorder %s993_s26, 1  ;;  %p1066_p10 = scmp.lt.s32.totalorder %s1241_s24, 2 }
   0xf   : > { %p1373_p11 = por %p308_p7, %p68_p0  ;;  %s371_s17 = sand.u32 1, %s1237_s23  }
  0x10   : > { %p1377_p12 = por %p314_p8, %p74_p3  ;;  %s377_s20 = scalar_lea.hbm %s1554_s1, %s1241_s24 }
  0x11   : > { %s379_s28 = sshll.u32 %s377_s20, 4  ;;  %s374_s29 = scalar_lea.vmem [#allocation2], %s371_s17  ;;  %s380_s28 = int_to_ptr.hbm [resolvable:$true] %s379_s28 }
  0x12   : > { %s1576_s16 = scalar_select %p1377_p12, 1, 0 }
  0x13   : > { %s381_s30 = sshll.u32 %s374_s29, 4  ;;  %p1388_p13 = pnand %p1066_p10, %p1362_p5  ;;  %s382_s30 = int_to_ptr.vmem [resolvable:$true] %s381_s30 }
  0x14   : > { %1577 = sst [smem:[#allocation11_spill]] %s1576_s16  ;;  %p996_p0 = scmp.ge.s32.totalorder %s1241_s24, 1 }
  0x15   : > { %p386_p1 = scmp.lt.s32.totalorder %s1241_s24, 3  ;;  %s372_s27 = scalar_lea.sflag [#allocation3], %s371_s17 }
  0x16   : > { %s1145_s16 = sshra.s32 %s380_s28, 4  ;;  %p1149_p3 = pneg %p1388_p13  ;;  %s1146_s16 = int_to_ptr.hbm [resolvable:$true] %s1145_s16 }
  0x17   : > { %s1147_s23 = scalar_lea.hbm %s1146_s16, 1  ;;  %s1152_s13 = scalar_lea.hbm %s1554_s1, 2 }
  0x18   : > { %p1148_p2 = scmp.ne.s32.totalorder %s1146_s16, %s1147_s23  ;;  %p1153_p5 = scmp.lt.s32.totalorder %s1146_s16, %s1554_s1 }
  0x19   : > { %p1154_p8 = scmp.lt.s32.totalorder %s1152_s13, %s1147_s23 }
  0x1a   : > { %p1150_p4 = pnand %p1149_p3, %p1148_p2 }
  0x1b   : > { %p1155_p10 = por %p1154_p8, %p1153_p5 }
  0x1c   : > { %p1151_p7 = pneg %p1150_p4 }
  0x1e   : > { %p1156_p9 = pnand %p1155_p10, %p1151_p7 }
  0x20   : > { %1159 = shalt.err (!%p1156_p9)
}
  0x21   : > { %1061 = dma.hbm_to_vmem [thread:$0]  (!%p1388_p13), %s380_s28, 16, %s382_s30, %s372_s27  }
  0x22   : > { %p387_p2 = pnand %p996_p0, %p386_p1 }
  0x23   : > { %s1409_s17 = sand.u32 (!%p387_p2), 1, %s1233_s22  }
  0x24   : > { %390 = sbr.rel (%p387_p2) target bundleno = 1792 (0x700), region = 68  ;;  %s393_s16 = scalar_lea.sflag (!%p387_p2), [#allocation3], %s1409_s17 }
  0x25   : > { %s395_s23 = scalar_lea.vmem (!%p387_p2), [#allocation2], %s1409_s17 }
  0x29   : > { %1220 = dma.done.wait (%p1366_p6), %s393_s16, 16  }
  0x2a   : > { %1222 = vsyncadd (%p1366_p6), %s393_s16, 4294967280  ;;  %p440_p9 = scmp.lt.s32.totalorder %s1344_s25, 1  ;;  %v1047_v0 = vld [vmem:[%s1555_s2 + $0x8] sm:$0xff]  ;;  %v1046_v1 = vld [vmem:[%s1555_s2] sm:$0xff]  ;;  %vm467_vm0 = vcmask 261120   ;;  %s1245_s28 = smov 96  }
  0x2b   : > { %477 = vmatpush.bf16.msra.mxu0 %v1047_v0  ;;  %v1115_v4 = vld [vmem:[%s1556_s3] ss:$0 sm:$0xff]  ;;  %s1246_s26 = smov 80   ;;  %s1248_s19 = smov 88   ;;  %vm494_vm1 = vcmask 64512   ;;  %vm531_vm2 = vcmask 1043456  }
  0x2c   : > { %s441_s27 = scalar_select %p440_p9, %s1344_s25, 1  ;;  %v1116_v22 = vld [vmem:[%s395_s23] ss:$0 sm:$0xff]  ;;  %vm729_vm3 = vcmask 130048   ;;  %vm731_vm4 = vcmask 195584   ;;  %vm848_vm9 = vcmask 523264  }
  0x2d   : > { %s1249_s13 = smov 112   ;;  %s1250_s23 = smov 64  }
  0x2e   : > { %s998_s30 = sshll.u32 %s441_s27, 3  ;;  %s1243_s27 = smov 104  }
  0x2f   : > { %s443_s18 = scalar_lea.vmem %s1553_s0, %s998_s30  ;;  %478 = vmatpush.bf16.msra.mxu0 %v1046_v1  ;;  %s1244_s30 = smov 120  }
  0x30   : > { %v1428_v2 = vld [vmem:[%s443_s18] sm:$0xff]  ;;  %s1247_s18 = smov 72   ;;  %s1251_s20 = smov 40  }
  0x31   : > { %v446_v3 = vpack.c.bf16 %v1428_v2, %v1428_v2  ;;  %s1252_s29 = smov 56   ;;  %s1253_s14 = smov 48  }
  0x32   : > { %s1254_s16 = smov 8  }
  0x33   : > { %1007 = vmatmul.msk.bf16.vlgmr.msra.gmra.mxu0 %vm467_vm0, %v446_v3 }
  0xb0   : > { %v480_v5 = vpop.f32.mrf.mxu0 }
  0xb1   : > { %v481_v6 = vadd.f32 %v1115_v4, %v480_v5 }
  0xb3   : > { %v484_v7 = vpack.c.bf16 %v481_v6, %v481_v6 }
  0xb5   : > { %v490_v8 = vunpack.c.l.b16 %v484_v7 }
  0xb7   : > { %v1436_v9 = vpack.c.b16 %v490_v8, %v490_v8 }
  0xb8   : > { %v482_v10 = vpop.f32.mrf.mxu0 }
  0xb9   : > { %660 = vrot.lane.b32.xlu2 %v1436_v9, %s1243_s27  ;;  %548 = vrot.lane.b32.xlu1 %v1436_v9, %s1244_s30  ;;  %s1255_s27 = smov 16   ;;  %s1256_s30 = smov 24  }
  0xba   : > { %492 = vrot.lane.b32.xlu0 %v1436_v9, %s1245_s28 }
  0xc1   : > { %606 = vrot.lane.b32.xlu2 %v1436_v9, %s1246_s26  ;;  %662 = vrot.lane.b32.xlu1 %v1436_v9, %s1247_s18 }
  0xc2   : > { %550 = vrot.lane.b32.xlu0 %v1436_v9, %s1248_s19 }
  0xca   : > { %604 = vrot.lane.b32.xlu0 %v1436_v9, %s1249_s13 }
 0x113   : > { %v661_v11 = vpop.permute.xlu2 %660 }
 0x11b   : > { %v607_v12 = vpop.permute.xlu2 %606 }
 0x11c   : > { %v612_v13 = vsel %vm494_vm1, %v607_v12, 0 }
 0x11d   : > { %621 = vmatpush.bf16.xpose.msrb.mxu0 %v612_v13 }
 0x12b   : > { %v549_v14 = vpop.permute.xlu1 %548 }
 0x12c   : > { %v493_v15 = vpop.permute.xlu0 %492 }
 0x12d   : > { %v499_v16 = vsel %vm494_vm1, %v493_v15, 0 }
 0x12e   : > { %508 = vmatpush.bf16.xpose.msra.mxu1 %v499_v16 }
 0x133   : > { %v663_v17 = vpop.permute.xlu1 %662 }
 0x134   : > { %v551_v18 = vpop.permute.xlu0 %550  ;;  %v668_v19 = vsel %vm494_vm1, %v663_v17, 0 }
 0x135   : > { %1008 = vmatmul.msk.bf16.vlgmr.msra.gmra.mxu1 %vm494_vm1, %v484_v7  ;;  %v556_v20 = vsel %vm494_vm1, %v551_v18, 0 }
 0x136   : > { %565 = vmatpush.bf16.xpose.msra.mxu3 %v556_v20 }
 0x13c   : > { %v605_v21 = vpop.permute.xlu0 %604 }
 0x13d   : > { %1010 = vmatmul.msk.bf16.vlgmr.msra.gmra.mxu3 %vm494_vm1, %v549_v14  ;;  %1012 = vmatmul.msk.bf16.vlgmr.msrb.gmra.mxu0 %vm494_vm1, %v605_v21 }
 0x13e   : > { %677 = vmatpush.bf16.xpose.msrb.mxu3 %v668_v19 }
 0x14d   : > { %1014 = vmatmul.msk.bf16.vlgmr.msrb.gmra.mxu3 %vm494_vm1, %v661_v11 }
 0x1b2   : > { %v510_v23 = vpop.f32.mrf.mxu1 }
 0x1b3   : > { %v511_v24 = vadd.f32 %v1116_v22, %v510_v23 }
 0x1b5   : > { %v514_v25 = vsel %vm494_vm1, %v511_v24, -inf }
 0x1b6   : > { %515 = vmax.xlane.f32.xlu1 %v514_v25 }
 0x1ba   : > { %v512_v26 = vpop.f32.mrf.mxu1  ;;  %v623_v27 = vpop.f32.mrf.mxu0 }
 0x1bb   : > { %v624_v32 = vadd.f32 %v1116_v22, %v623_v27 }
 0x1bd   : > { %v627_v34 = vsel %vm494_vm1, %v624_v32, -inf }
 0x1c0   : > { %v567_v28 = vpop.f32.mrf.mxu3 }
 0x1c1   : > { %v568_v29 = vadd.f32 %v1116_v22, %v567_v28 }
 0x1c2   : > { %v625_v30 = vpop.f32.mrf.mxu0 }
 0x1c3   : > { %v571_v31 = vsel %vm494_vm1, %v568_v29, -inf }
 0x1c4   : > { %572 = vmax.xlane.f32.xlu2 %v571_v31 }
 0x1c8   : > { %v569_v33 = vpop.f32.mrf.mxu3 }
 0x1cc   : > { %628 = vmax.xlane.f32.xlu2 %v627_v34 }
 0x1d0   : > { %v679_v35 = vpop.f32.mrf.mxu3 }
 0x1d1   : > { %v680_v36 = vadd.f32 %v1116_v22, %v679_v35 }
 0x1d3   : > { %v683_v37 = vsel %vm494_vm1, %v680_v36, -inf }
 0x1d4   : > { %684 = vmax.xlane.f32.xlu0 %v683_v37 }
 0x1d8   : > { %v681_v38 = vpop.f32.mrf.mxu3 }
 0x1e4   : > { %526 = vrot.lane.b32.xlu2 %v1436_v9, %s1250_s23 }
 0x1ec   : > { %695 = vrot.lane.b32.xlu2 %v1436_v9, %s1251_s20 }
 0x229   : > { %v516_v39 = vpop.xlane.xlu1 %515 }
 0x22a   : > { %v517_v40 = vsub.f32 %v511_v24, %v516_v39 }
 0x22c   : > { %v518_v41 = vmul.f32 1.442695, %v517_v40 }
 0x22e   : > { %1123 = vpow2.f32 %v518_v41 }
 0x234   : > { %v1124_v42 = vpop.eup %1123 }
 0x235   : > { %v520_v43 = vsel %vm494_vm1, %v1124_v42, 0.0 }
 0x236   : > { %521 = vadd.xlane.f32.xlu1 %v520_v43 }
 0x237   : > { %v573_v44 = vpop.xlane.xlu2 %572 }
 0x238   : > { %v574_v47 = vsub.f32 %v568_v29, %v573_v44 }
 0x23a   : > { %v575_v49 = vmul.f32 1.442695, %v574_v47 }
 0x23f   : > { %v629_v45 = vpop.xlane.xlu2 %628 }
 0x240   : > { %v630_v46 = vsub.f32 %v624_v32, %v629_v45 }
 0x242   : > { %v631_v48 = vmul.f32 1.442695, %v630_v46 }
 0x244   : > { %1125 = vpow2.f32 %v631_v48  ;;  %v1048_v48 = vld [vmem:[%s1559_s6] sm:$0xff] }
 0x245   : > { %1127 = vpow2.f32 %v575_v49  ;;  %v1053_v49 = vld [vmem:[%s1561_s8 + $0x18] sm:$0xff] }
 0x247   : > { %v527_v50 = vpop.permute.xlu2 %526  ;;  %v685_v51 = vpop.xlane.xlu0 %684 }
 0x248   : > { %v533_v52 = vsel %vm531_vm2, %v527_v50, 0  ;;  %v686_v54 = vsub.f32 %v680_v36, %v685_v51  ;;  %v1257_v36 = vmov 32.0  }
 0x249   : > { %542 = vmatpush.bf16.msra.mxu2 %v533_v52  ;;  %v1052_v52 = vld [vmem:[%s1561_s8 + $0x10] sm:$0xff] }
 0x24a   : > { %v1126_v53 = vpop.eup %1125  ;;  %v687_v56 = vmul.f32 1.442695, %v686_v54  ;;  %v1051_v54 = vld [vmem:[%s1561_s8 + $0x8] sm:$0xff] }
 0x24b   : > { %v633_v55 = vsel %vm494_vm1, %v1126_v53, 0.0  ;;  %v1128_v57 = vpop.eup %1127 }
 0x24c   : > { %634 = vadd.xlane.f32.xlu0 %v633_v55  ;;  %1129 = vpow2.f32 %v687_v56  ;;  %v577_v58 = vsel %vm494_vm1, %v1128_v57, 0.0 }
 0x24f   : > { %583 = vrot.lane.b32.xlu1 %v1436_v9, %s1252_s29  ;;  %v696_v3 = vpop.permute.xlu2 %695  ;;  %s900_s29 = scalar_lea.sflag [#allocation4], %s1409_s17 }
 0x250   : > { %v701_v6 = vsel %vm531_vm2, %v696_v3, 0 }
 0x252   : > { %v1130_v59 = vpop.eup %1129 }
 0x253   : > { %v689_v60 = vsel %vm494_vm1, %v1130_v59, 0.0 }
 0x254   : > { %578 = vadd.xlane.f32.xlu0 %v577_v58 }
 0x25c   : > { %690 = vadd.xlane.f32.xlu0 %v689_v60 }
 0x270   : > { %639 = vrot.lane.b32.xlu0 %v1436_v9, %s1253_s14  ;;  %s997_s14 = sshll.u32 %s1409_s17, 3 }
 0x2a9   : > { %v522_v61 = vpop.xlane.xlu1 %521 }
 0x2aa   : > { %1131 = vrcp.f32 %v522_v61  ;;  %v1117_v61 = vld [vmem:[%s1557_s4] ss:$0 sm:$0xff] }
 0x2b0   : > { %v1132_v62 = vpop.eup %1131 }
 0x2b1   : > { %v524_v63 = vmul.f32 %v1132_v62, %v1124_v42 }
 0x2b3   : > { %v525_v0 = vpack.c.bf16 %v524_v63, %v524_v63  ;;  %v1118_v63 = vld [vmem:[%s1558_s5] ss:$0 sm:$0xff] }
 0x2b5   : > { %1009 = vmatmul.msk.bf16.vlgmr.msra.gmra.mxu2 %vm494_vm1, %v525_v0 }
 0x2bf   : > { %v635_v1 = vpop.xlane.xlu0 %634 }
 0x2c1   : > { %v584_v4 = vpop.permute.xlu1 %583 }
 0x2c2   : > { %v589_v5 = vsel %vm531_vm2, %v584_v4, 0 }
 0x2c3   : > { %598 = vmatpush.bf16.msrb.mxu2 %v589_v5  ;;  %v1050_v5 = vld [vmem:[%s1561_s8] sm:$0xff] }
 0x2c7   : > { %710 = vmatpush.bf16.msra.mxu2 %v701_v6  ;;  %v579_v7 = vpop.xlane.xlu0 %578  ;;  %v1119_v6 = vld [vmem:[%s1560_s7] ss:$0 sm:$0xff] }
 0x2c8   : > { %1133 = vrcp.f32 %v579_v7 }
 0x2ce   : > { %v1134_v8 = vpop.eup %1133 }
 0x2cf   : > { %v581_v9 = vmul.f32 %v1134_v8, %v1128_v57  ;;  %v691_v10 = vpop.xlane.xlu0 %690 }
 0x2d0   : > { %1135 = vrcp.f32 %v691_v10 }
 0x2d1   : > { %v582_v11 = vpack.c.bf16 %v581_v9, %v581_v9  ;;  %1137 = vrcp.f32 %v635_v1 }
 0x2d2   : > { %1139 = vrcp.f32 %v1257_v36 }
 0x2d3   : > { %1011 = vmatmul.msk.bf16.vlgmr.msrb.gmra.mxu2 %vm494_vm1, %v582_v11 }
 0x2d6   : > { %v1136_v12 = vpop.eup %1135 }
 0x2d7   : > { %v693_v13 = vmul.f32 %v1136_v12, %v1130_v59  ;;  %v1138_v14 = vpop.eup %1137  ;;  %v1120_v12 = vld [vmem:[%s1562_s9] ss:$0 sm:$0xff] }
 0x2d8   : > { %v637_v15 = vmul.f32 %v1138_v14, %v1126_v53  ;;  %v1140_v37 = vpop.eup %1139 }
 0x2d9   : > { %v694_v16 = vpack.c.bf16 %v693_v13, %v693_v13  ;;  %v740_v38 = vmul.f32 32.0, %v1140_v37  ;;  %vm744_vm5 = vweird.f32 %v1140_v37 }
 0x2da   : > { %v638_v19 = vpack.c.bf16 %v637_v15, %v637_v15 }
 0x2db   : > { %v741_v39 = vsub.f32 1.0, %v740_v38 }
 0x2dd   : > { %v742_v40 = vmul.f32 %v1140_v37, %v741_v39 }
 0x2df   : > { %v743_v41 = vadd.f32 %v1140_v37, %v742_v40 }
 0x2e1   : > { %v745_v42 = vsel %vm744_vm5, %v1140_v37, %v743_v41 }
 0x2e2   : > { %v640_v17 = vpop.permute.xlu0 %639 }
 0x2e3   : > { %1015 = vmatmul.msk.bf16.vlgmr.msra.gmra.mxu2 %vm494_vm1, %v694_v16  ;;  %v645_v18 = vsel %vm531_vm2, %v640_v17, 0 }
 0x2e4   : > { %654 = vmatpush.bf16.msrb.mxu1 %v645_v18 }
 0x2e7   : > { %1013 = vmatmul.msk.bf16.vlgmr.msrb.gmra.mxu1 %vm494_vm1, %v638_v19 }
 0x2e8   : > { %856 = vmatpush.bf16.msra.mxu1 %v1053_v49 }
 0x2ec   : > { %857 = vmatpush.bf16.msra.mxu1 %v1052_v52 }
 0x2f0   : > { %858 = vmatpush.bf16.msra.mxu1 %v1051_v54 }
 0x2f4   : > { %859 = vmatpush.bf16.msra.mxu1 %v1050_v5 }
 0x338   : > { %v544_v20 = vpop.f32.mrf.mxu2 }
 0x340   : > { %v546_v21 = vpop.f32.mrf.mxu2 }
 0x356   : > { %v600_v22 = vpop.f32.mrf.mxu2 }
 0x357   : > { %717 = vrot.lane.b32.xlu1 %v600_v22, %s1254_s16  ;;  %s1043_s16 = sshll.u32 %s1344_s25, 3  ;;  %s439_s25 = scalar_lea.vmem [#allocation5], %s997_s14 }
 0x358   : > { %s910_s18 = scalar_lea.hbm %s1565_s12, %s1043_s16  ;;  %s912_s23 = sshll.u32 %s439_s25, 4  ;;  %s913_s23 = int_to_ptr.vmem [resolvable:$true] %s912_s23 }
 0x359   : > { %s914_s20 = sshll.u32 %s910_s18, 4  ;;  %s1195_s14 = scalar_lea.hbm %s1565_s12, 16  ;;  %s915_s20 = int_to_ptr.hbm [resolvable:$true] %s914_s20 }
 0x35e   : > { %v602_v23 = vpop.f32.mrf.mxu2 }
 0x364   : > { %v656_v24 = vpop.f32.mrf.mxu1 }
 0x365   : > { %721 = vrot.lane.b32.xlu2 %v656_v24, %s1255_s27  ;;  %s1189_s27 = sshra.s32 %s915_s20, 4  ;;  %s1190_s27 = int_to_ptr.hbm [resolvable:$true] %s1189_s27 }
 0x366   : > { %v712_v25 = vpop.f32.mrf.mxu2  ;;  %s1191_s16 = scalar_lea.hbm %s1190_s27, 8  ;;  %p1196_p1 = scmp.lt.s32.totalorder %s1190_s27, %s1565_s12 }
 0x367   : > { %725 = vrot.lane.b32.xlu1 %v712_v25, %s1256_s30  ;;  %p1192_p6 = scmp.ne.s32.totalorder %s1190_s27, %s1191_s16  ;;  %p1197_p3 = scmp.lt.s32.totalorder %s1195_s14, %s1191_s16 }
 0x369   : > { %p1193_p13 = pnand %p1192_p6, %p1373_p11  ;;  %p1198_p4 = por %p1197_p3, %p1196_p1 }
 0x36b   : > { %p1194_p0 = pneg %p1193_p13 }
 0x36c   : > { %v658_v26 = vpop.f32.mrf.mxu1 }
 0x36d   : > { %p1199_p7 = pnand %p1198_p4, %p1194_p0 }
 0x36e   : > { %v714_v27 = vpop.f32.mrf.mxu2 }
 0x3bf   : > { %v722_v30 = vpop.permute.xlu2 %721 }
 0x3c9   : > { %v718_v28 = vpop.permute.xlu1 %717 }
 0x3ca   : > { %v728_v29 = vsel %vm494_vm1, %v544_v20, %v718_v28 }
 0x3cb   : > { %v730_v32 = vsel %vm729_vm3, %v728_v29, %v722_v30 }
 0x3d9   : > { %v726_v31 = vpop.permute.xlu1 %725 }
 0x3da   : > { %v732_v33 = vsel %vm731_vm4, %v730_v32, %v726_v31  ;;  %v1121_v32 = vld [vmem:[%s1563_s10] ss:$0 sm:$0xff] }
 0x3db   : > { %v733_v34 = vadd.f32 %v732_v33, %v1428_v2  ;;  %v1049_v2 = vld [vmem:[%s1559_s6 + $0x8] sm:$0xff] }
 0x3dc   : > { %803 = vmatpush.bf16.msra.mxu0 %v1049_v2 }
 0x3dd   : > { %v736_v35 = vsel %vm467_vm0, %v733_v34, 0.0 }
 0x3de   : > { %737 = vadd.xlane.f32.xlu2 %v736_v35  ;;  %v1122_v35 = vld [vmem:[%s1564_s11] ss:$0 sm:$0xff] }
 0x3e0   : > { %804 = vmatpush.bf16.msra.mxu0 %v1048_v48 }
 0x451   : > { %v738_v43 = vpop.xlane.xlu2 %737 }
 0x452   : > { %v746_v44 = vmul.f32 %v745_v42, %v738_v43 }
 0x454   : > { %v747_v45 = vsub.f32 %v733_v34, %v746_v44 }
 0x456   : > { %v748_v46 = vmul.f32 %v747_v45, %v747_v45 }
 0x458   : > { %v749_v47 = vsel %vm467_vm0, %v748_v46, 0.0 }
 0x459   : > { %750 = vadd.xlane.f32.xlu1 %v749_v47 }
 0x4cc   : > { %v751_v50 = vpop.xlane.xlu1 %750 }
 0x4cd   : > { %v752_v51 = vmul.f32 %v751_v50, %v745_v42 }
 0x4cf   : > { %v753_v53 = vadd.f32 1e-05, %v752_v51 }
 0x4d1   : > { %1141 = vrsqrt.f32 %v753_v53  ;;  %vm760_vm7 = vweird.f32 %v753_v53 }
 0x4d7   : > { %v1142_v55 = vpop.eup %1141 }
 0x4d8   : > { %v755_v56 = vmul.f32 %v1142_v55, %v753_v53  ;;  %vm761_vm6 = vweird.f32 %v1142_v55 }
 0x4d9   : > { %vm762_vm8 = vmor %vm760_vm7, %vm761_vm6 }
 0x4da   : > { %v756_v57 = vmul.f32 %v1142_v55, %v755_v56 }
 0x4dc   : > { %v757_v58 = vmul.f32 0.5, %v756_v57 }
 0x4de   : > { %v758_v59 = vsub.f32 1.5, %v757_v58 }
 0x4e0   : > { %v759_v60 = vmul.f32 %v1142_v55, %v758_v59 }
 0x4e2   : > { %v763_v62 = vsel %vm762_vm8, %v1142_v55, %v759_v60 }
 0x4e3   : > { %v764_v0 = vmul.f32 %v763_v62, %v747_v45 }
 0x4e5   : > { %v768_v1 = vmul.f32 %v1117_v61, %v764_v0 }
 0x4e7   : > { %v772_v3 = vadd.f32 %v1118_v63, %v768_v1 }
 0x4e9   : > { %v773_v4 = vpack.c.bf16 %v772_v3, %v772_v3 }
 0x4eb   : > { %1024 = vmatmul.msk.bf16.vlgmr.msra.gmra.mxu0 %vm467_vm0, %v773_v4 }
 0x568   : > { %v806_v7 = vpop.f32.mrf.mxu0 }
 0x569   : > { %v807_v8 = vadd.f32 %v1119_v6, %v806_v7 }
 0x56b   : > { %v810_v9 = vmax.f32 %v807_v8, 0.0 }
 0x56d   : > { %v811_v10 = vpack.c.bf16 %v810_v9, %v810_v9 }
 0x56f   : > { %1041 = vmatmul.msk.bf16.vlgmr.msra.gmra.mxu1 %vm848_vm9, %v811_v10 }
 0x570   : > { %v808_v11 = vpop.f32.mrf.mxu0 }
 0x5ec   : > { %v861_v13 = vpop.f32.mrf.mxu1 }
 0x5ed   : > { %v862_v14 = vadd.f32 %v1120_v12, %v861_v13 }
 0x5ef   : > { %v865_v15 = vadd.f32 %v862_v14, %v772_v3 }
 0x5f1   : > { %v868_v16 = vsel %vm467_vm0, %v865_v15, 0.0 }
 0x5f2   : > { %869 = vadd.xlane.f32.xlu0 %v868_v16 }
 0x5f4   : > { %v863_v17 = vpop.f32.mrf.mxu1 }
 0x665   : > { %v870_v18 = vpop.xlane.xlu0 %869 }
 0x666   : > { %v871_v19 = vmul.f32 %v870_v18, %v745_v42 }
 0x668   : > { %v872_v20 = vsub.f32 %v865_v15, %v871_v19 }
 0x66a   : > { %v873_v21 = vmul.f32 %v872_v20, %v872_v20 }
 0x66c   : > { %v874_v22 = vsel %vm467_vm0, %v873_v21, 0.0 }
 0x66d   : > { %875 = vadd.xlane.f32.xlu2 %v874_v22 }
 0x6e0   : > { %v876_v23 = vpop.xlane.xlu2 %875 }
 0x6e1   : > { %v877_v24 = vmul.f32 %v876_v23, %v745_v42 }
 0x6e3   : > { %v878_v25 = vadd.f32 1e-05, %v877_v24 }
 0x6e5   : > { %1143 = vrsqrt.f32 %v878_v25  ;;  %vm885_vm11 = vweird.f32 %v878_v25 }
 0x6eb   : > { %v1144_v26 = vpop.eup %1143 }
 0x6ec   : > { %v880_v27 = vmul.f32 %v1144_v26, %v878_v25  ;;  %vm886_vm10 = vweird.f32 %v1144_v26 }
 0x6ed   : > { %vm887_vm12 = vmor %vm885_vm11, %vm886_vm10 }
 0x6ee   : > { %v881_v28 = vmul.f32 %v1144_v26, %v880_v27 }
 0x6f0   : > { %v882_v29 = vmul.f32 0.5, %v881_v28 }
 0x6f2   : > { %v883_v30 = vsub.f32 1.5, %v882_v29 }
 0x6f4   : > { %v884_v31 = vmul.f32 %v1144_v26, %v883_v30 }
 0x6f6   : > { %v888_v33 = vsel %vm887_vm12, %v1144_v26, %v884_v31 }
 0x6f7   : > { %v889_v34 = vmul.f32 %v888_v33, %v872_v20 }
 0x6f9   : > { %v893_v36 = vmul.f32 %v1121_v32, %v889_v34 }
 0x6fb   : > { %v897_v37 = vadd.f32 %v1122_v35, %v893_v36 }
 0x6fd   : > { %898 = vst.msk [vmem:[%s439_s25] sm:$0xff] %vm467_vm0, %v897_v37 }
 0x6fe   : > { %1202 = shalt.err (!%p1199_p7)
}
 0x6ff   : > { %1056 = dma.vmem_to_hbm [thread:$0]  (%p1373_p11), %s913_s23, 128, %s915_s20, %s900_s29  }
 0x700 PF: > { %s926_s19 = sand.u32 1, %s1229_s21   ;;  %p1580_p5 = scmp.ge.s32.totalorder %s1241_s24, 2 }
 0x701   : > { %s927_s13 = scalar_lea.sflag [#allocation4], %s926_s19 }
 0x702   : > { %p1063_p8 = pnand %p1580_p5, %p1377_p12 }
 0x704   : > { %p1064_p10 = pneg %p1063_p8 }
 0x706   : > { %1224 = dma.done.wait (%p1064_p10), %s927_s13, 128  }
 0x707   : > { %1226 = vsyncadd (%p1064_p10), %s927_s13, 4294967168  ;;  %s1581_s24 = sld [smem:[#allocation9_spill]]  ;;  %s1584_s21 = smov %s1233_s22 }
 0x708   : > { %s1582_s25 = sld [smem:[#allocation8_spill]] }
 0x709   : > { %s1583_s23 = sld [smem:[#allocation10_spill]] }
 0x70d   : > { %p25_p2 = scmp.ge.s32.totalorder %s1581_s24, 4  }
 0x70e   : > { %s1585_s22 = smov %s1582_s25 }
 0x70f   :  { %27 = sbr.rel (!%p25_p2) target bundleno = 5 (0x5), region = 116 }
 0x714   :  { %933 = vsyncpa [#allocation3], 1 }
 0x715   :  { %935 = vsyncpa [#allocation3 + $0x1], 1 }
 0x716   :  { %936 = vsyncpa [#allocation4], 1 }
 0x717   :  { %938 = vsyncpa [#allocation4 + $0x1], 1 }

</bundles_post_ra>
